<compile_context>
chip_gen: v7x
topology: tpu7x:2x2x1
jax: 0.10.0
libtpu: 0.0.40
codegen_flags: <defaults>
</compile_context>

<pallas_src>
import functools

import numpy as np

import jax
import jax.numpy as jnp
from jax.experimental import pallas as pl
from jax.experimental.pallas import tpu as pltpu


# ----------------------------- Pallas kernel --------------------------------
def gnn_kernel(a_ref, x_ref, p_ref, inv_ref,
               w1_ref, w2_ref, w3_ref, wfc_ref, b_ref,
               out_ref, *, h_pad, o_pad):
    # One grid step == one group of whole graphs (block-diagonal A slice).
    a = a_ref[0]          # (TN, TN) bf16, VMEM-resident across all 3 layers
    h = x_ref[0]          # (TN, Fp) bf16

    def gcn_relu(h, w_ref, bias_row):
        bias = b_ref[bias_row:bias_row + 1, 0:h_pad]                      # (1, Hp) f32
        # GCNConv: A_hat @ (H @ W) + b, ReLU.  bf16 MXU inputs, f32 accumulate.
        hw = jnp.dot(h, w_ref[...], preferred_element_type=jnp.float32)
        agg = jnp.dot(a, hw.astype(jnp.bfloat16),
                      preferred_element_type=jnp.float32) + bias
        return jnp.maximum(agg, 0.0).astype(jnp.bfloat16)

    h = gcn_relu(h, w1_ref, 0)
    h = gcn_relu(h, w2_ref, 1)
    h = gcn_relu(h, w3_ref, 2)

    # global_mean_pool: exact bf16 one-hot matmul (f32 accumulation), then the
    # exact f32 1/count scaling (no bf16 rounding of the mean divisor).
    pooled = jnp.dot(p_ref[0], h, preferred_element_type=jnp.float32)     # (Gt, Hp)
    pooled = pooled * inv_ref[0]                                          # (Gt, 1) f32 bcast

    # fc: (Gt, Hp) @ (Hp, Op) + b_fc   (lane-dense f32 output store)
    out_ref[0] = (jnp.dot(pooled.astype(jnp.bfloat16), wfc_ref[...],
                          preferred_element_type=jnp.float32)
                  + b_ref[3:4, 0:o_pad])


# ------------------------------ JAX wrapper ----------------------------------
def _round_up(x, m):
    return ((x + m - 1) // m) * m


def gnn_forward(x, edge_index, batch, params, num_graphs, tile_nodes=128):
    n, f_in = x.shape
    w1, b1, w2, b2, w3, b3, wfc, bfc = params
    hidden = w1.shape[1]
    out_dim = wfc.shape[1]

    f_pad = _round_up(f_in, 128)
    h_pad = _round_up(hidden, 128)
    o_pad = _round_up(out_dim, 128)

    # ---------------- host-side graph packing (concrete, O(N + E)) ------------
    batch_np = np.asarray(batch)
    src_np = np.asarray(edge_index[0])
    dst_np = np.asarray(edge_index[1])

    counts = np.maximum(np.bincount(batch_np, minlength=num_graphs), 0).astype(np.int64)
    if counts.max() > tile_nodes:
        # TODO(synk): graphs larger than tile_nodes need a (row-tile, K-reduction)
        # grid over A with an f32 VMEM accumulator (pl.when init/finalize).
        raise ValueError("a single graph exceeds tile_nodes; enlarge tile_nodes")
    assert np.all(np.diff(batch_np) >= 0), "batch must be sorted (PyG batching)"
    assert np.all(batch_np[src_np] == batch_np[dst_np]), "cross-graph edge found"

    graph_start = np.concatenate([[0], np.cumsum(counts)[:-1]]).astype(np.int64)

    group_of_graph = np.zeros(num_graphs, np.int32)
    local_graph = np.zeros(num_graphs, np.int32)
    node_base = np.zeros(num_graphs, np.int32)
    gid, used, n_in_group = 0, 0, 0
    for g in range(num_graphs):
        c = int(counts[g])
        if used + c > tile_nodes:
            gid += 1
            used = 0
            n_in_group = 0
        group_of_graph[g] = gid
        local_graph[g] = n_in_group
        node_base[g] = used
        used += c
        n_in_group += 1
    num_groups = gid + 1
    gt = int(np.max(np.bincount(group_of_graph, minlength=num_groups)))
    gt_pad = _round_up(max(gt, 1), 8)

    node_ids = np.arange(n, dtype=np.int64)
    off_in_graph = node_ids - graph_start[batch_np]
    grp_n = group_of_graph[batch_np]                        # group of each node
    loc_n = (node_base[batch_np] + off_in_graph).astype(np.int32)
    lgr_n = local_graph[batch_np]                           # local graph slot of each node

    # ------------- O(E) gcn_norm edge weights (device, segment_sum) -----------
    src = edge_index[0]
    dst = edge_index[1]
    ones_e = jnp.ones(src.shape[0], jnp.float32)
    deg_e = jax.ops.segment_sum(ones_e, dst, num_segments=n)
    has_self = jax.ops.segment_sum((src == dst).astype(jnp.float32), dst, num_segments=n)
    self_w = jnp.where(has_self > 0.0, 0.0, 1.0)            # add self loop only where missing
    dinv = jax.lax.rsqrt(jnp.maximum(deg_e + self_w, 1e-12))
    w_edge = dinv[dst] * dinv[src]                          # A_hat[dst, src] contribution
    w_self = self_w * dinv * dinv                           # added self-loop contribution

    # ---------------- block-diagonal packed operands (per group) --------------
    grp_e = grp_n[dst_np]
    loc_d = loc_n[dst_np]
    loc_s = loc_n[src_np]

    a_blocks = jnp.zeros((num_groups, tile_nodes, tile_nodes), jnp.float32)
    a_blocks = a_blocks.at[grp_e, loc_d, loc_s].add(w_edge)
    a_blocks = a_blocks.at[grp_n, loc_n, loc_n].add(w_self)
    a_bf = a_blocks.astype(jnp.bfloat16)                    # within 2e-2 tol (review note)

    x_pad = jnp.pad(x, ((0, 0), (0, f_pad - f_in))).astype(jnp.bfloat16)
    x_blocks = jnp.zeros((num_groups, tile_nodes, f_pad), jnp.bfloat16)
    x_blocks = x_blocks.at[grp_n, loc_n].set(x_pad)

    pool = jnp.zeros((num_groups, gt_pad, tile_nodes), jnp.bfloat16)
    pool = pool.at[grp_n, lgr_n, loc_n].set(1.0)            # exact bf16 one-hot

    inv_cnt = jnp.zeros((num_groups, gt_pad, 1), jnp.float32)
    inv_cnt = inv_cnt.at[group_of_graph, local_graph, 0].set(
        1.0 / np.maximum(counts, 1).astype(np.float32))

    def pad2(m, rows, cols):
        return jnp.pad(m, ((0, rows - m.shape[0]), (0, cols - m.shape[1])))

    w1_bf = pad2(w1, f_pad, h_pad).astype(jnp.bfloat16)
    w2_bf = pad2(w2, h_pad, h_pad).astype(jnp.bfloat16)
    w3_bf = pad2(w3, h_pad, h_pad).astype(jnp.bfloat16)
    wfc_bf = pad2(wfc, h_pad, o_pad).astype(jnp.bfloat16)

    # All four biases packed into a single (8, 128*k) f32 tile (one operand).
    bdim = max(h_pad, o_pad)
    biases = jnp.zeros((8, bdim), jnp.float32)
    biases = biases.at[0, :hidden].set(b1.reshape(-1))
    biases = biases.at[1, :hidden].set(b2.reshape(-1))
    biases = biases.at[2, :hidden].set(b3.reshape(-1))
    biases = biases.at[3, :out_dim].set(bfc.reshape(-1))

    # ------------------------------- specs ------------------------------------
    # Rotating per-group blocks (default 2-deep double-buffering is the desired
    # pipeline depth for the streamed A/X/pool blocks).
    def rot(arr):
        return pl.BlockSpec((1,) + tuple(arr.shape[1:]), lambda i: (i, 0, 0))

    # Resident operands: constant block index -> fetched once, never re-DMA'd.
    def res(arr):
        return pl.BlockSpec(tuple(arr.shape), lambda i: (0, 0))

    in_specs = [rot(a_bf), rot(x_blocks), rot(pool), rot(inv_cnt),
                res(w1_bf), res(w2_bf), res(w3_bf), res(wfc_bf), res(biases)]
    out_spec = pl.BlockSpec((1, gt_pad, o_pad), lambda i: (i, 0, 0))

    # Advisory cost estimate so XLA schedules the graph-prep glue around us.
    flops = 2 * num_groups * (tile_nodes * f_pad * h_pad          # X @ W1
                              + 3 * tile_nodes * tile_nodes * h_pad   # 3x A @ (HW)
                              + 2 * tile_nodes * h_pad * h_pad        # H @ W2, H @ W3
                              + gt_pad * tile_nodes * h_pad           # pool @ H
                              + gt_pad * h_pad * o_pad)               # fc
    operands = (a_bf, x_blocks, pool, inv_cnt, w1_bf, w2_bf, w3_bf, wfc_bf, biases)
    bytes_accessed = sum(int(op.size) * op.dtype.itemsize for op in operands)
    bytes_accessed += num_groups * gt_pad * o_pad * 4

    # Accurate resident-VMEM estimate (+25% and a small flat headroom) instead of
    # over-requesting: every spec is double-buffered by the pipeline.
    per_step_blocks = (tile_nodes * tile_nodes * 2      # A block bf16
                       + tile_nodes * f_pad * 2         # X block bf16
                       + gt_pad * tile_nodes * 2        # pool block bf16
                       + gt_pad * 4                     # 1/count f32
                       + gt_pad * o_pad * 4)            # out block f32
    resident = sum(int(w.size) * w.dtype.itemsize
                   for w in (w1_bf, w2_bf, w3_bf, wfc_bf, biases))
    intermediates = 4 * tile_nodes * max(h_pad, f_pad) * 4 + 2 * gt_pad * h_pad * 4
    vmem_need = 2 * (per_step_blocks + resident) + intermediates
    vmem_limit = min(int(1.25 * vmem_need) + (4 << 20), 48 << 20)

    out_blocks = pl.pallas_call(
        functools.partial(gnn_kernel, h_pad=h_pad, o_pad=o_pad),
        out_shape=jax.ShapeDtypeStruct((num_groups, gt_pad, o_pad), jnp.float32),
        grid_spec=pltpu.PrefetchScalarGridSpec(
            num_scalar_prefetch=0,
            grid=(num_groups,),
            in_specs=in_specs,
            out_specs=out_spec),
        compiler_params=pltpu.CompilerParams(
            dimension_semantics=("parallel",),       # groups independent -> 2 TCs on v7x
            vmem_limit_bytes=int(vmem_limit)),
        cost_estimate=pl.CostEstimate(flops=int(flops), transcendentals=0,
                                      bytes_accessed=int(bytes_accessed)),
    )(*operands)

    g_idx = jnp.asarray(group_of_graph)
    l_idx = jnp.asarray(local_graph)
    return out_blocks[g_idx, l_idx, :out_dim]


# ----------------------- pure-JAX reference (test only) ----------------------
def build_dense_gcn_adjacency(edge_index, num_nodes):
    """Dense A_hat = D^-1/2 (A + I) D^-1/2 with A[dst, src] = 1 (PyG gcn_norm)."""
    src, dst = edge_index[0], edge_index[1]
    adj = jnp.zeros((num_nodes, num_nodes), jnp.float32)
    adj = adj.at[dst, src].add(1.0)
    diag = jnp.diagonal(adj)
    adj = adj + jnp.diag(jnp.where(diag > 0.0, 0.0, 1.0))
    deg = jnp.sum(adj, axis=1)
    dinv = jax.lax.rsqrt(jnp.maximum(deg, 1e-12))
    return adj * dinv[:, None] * dinv[None, :]


def reference_forward(x, edge_index, batch, params, num_graphs):
    a_hat = build_dense_gcn_adjacency(edge_index, x.shape[0])
    onehot = (batch[None, :] == jnp.arange(num_graphs)[:, None]).astype(jnp.float32)
    cnts = jnp.maximum(jnp.sum(onehot, axis=1, keepdims=True), 1.0)
    pool = onehot / cnts
    w1, b1, w2, b2, w3, b3, wfc, bfc = params
    h = jnp.maximum(a_hat @ (x @ w1) + b1, 0.0)
    h = jnp.maximum(a_hat @ (h @ w2) + b2, 0.0)
    h = jnp.maximum(a_hat @ (h @ w3) + b3, 0.0)
    return (pool @ h) @ wfc + bfc


# --------------------------------- main ---------------------------------------
if __name__ == "__main__":
    # Model config (matches the PyTorch module).
    num_node_features = 8
    num_edge_features = 4     # edge_attr is unused by GCNConv forward
    hidden_dim = 32
    output_dim = 8

    # ~1k node rows per launch (amortizes launch/DMA fixed cost); graphs of
    # varying size (8..24 nodes) exercise the host-side packing and the exact
    # f32 mean-pool divide.  Bidirectional chain graphs.
    num_graphs = 64
    sizes = [8 + 2 * (g % 9) for g in range(num_graphs)]
    src_list, dst_list, batch_list = [], [], []
    base = 0
    for g, s in enumerate(sizes):
        for i in range(s - 1):
            src_list += [base + i, base + i + 1]
            dst_list += [base + i + 1, base + i]
        batch_list += [g] * s
        base += s
    num_nodes = base                                            # 1016
    edge_index = jnp.array([src_list, dst_list], dtype=jnp.int32)
    batch = jnp.array(batch_list, dtype=jnp.int32)

    key = jax.random.PRNGKey(0)
    keys = jax.random.split(key, 10)
    x = jax.random.normal(keys[0], (num_nodes, num_node_features), jnp.float32)
    edge_attr = jax.random.normal(keys[1], (edge_index.shape[1], num_edge_features),
                                  jnp.float32)  # unused, kept for shape fidelity

    def init_w(k, shape):
        return 0.1 * jax.random.normal(k, shape, jnp.float32)

    params = (
        init_w(keys[2], (num_node_features, hidden_dim)),  # conv1 W
        init_w(keys[3], (1, hidden_dim)),                  # conv1 b
        init_w(keys[4], (hidden_dim, hidden_dim)),         # conv2 W
        init_w(keys[5], (1, hidden_dim)),                  # conv2 b
        init_w(keys[6], (hidden_dim, hidden_dim)),         # conv3 W
        init_w(keys[7], (1, hidden_dim)),                  # conv3 b
        init_w(keys[8], (hidden_dim, output_dim)),         # fc W
        init_w(keys[9], (1, output_dim)),                  # fc b
    )

    out = gnn_forward(x, edge_index, batch, params, num_graphs, tile_nodes=128)
    out = jax.block_until_ready(out)

    ref = reference_forward(x, edge_index, batch, params, num_graphs)
    assert out.shape == (num_graphs, output_dim)
    # bf16 MXU inputs with f32 accumulation -> loose-but-tight-enough tolerance.
    assert jnp.allclose(out, ref, atol=2e-2, rtol=2e-2), "mismatch vs JAX reference"

    print("KERNEL_OK")
</pallas_src>

<mosaic_0001>
module attributes {stable_mosaic.version = 11 : i64} {
  func.func @gnn_kernel(%arg0: i32, %arg1: memref<1x128x128xbf16, #tpu.memory_space<vmem>>, %arg2: memref<1x128x128xbf16, #tpu.memory_space<vmem>>, %arg3: memref<1x8x128xbf16, #tpu.memory_space<vmem>>, %arg4: memref<1x8x1xf32, #tpu.memory_space<vmem>>, %arg5: memref<128x128xbf16, #tpu.memory_space<vmem>>, %arg6: memref<128x128xbf16, #tpu.memory_space<vmem>>, %arg7: memref<128x128xbf16, #tpu.memory_space<vmem>>, %arg8: memref<128x128xbf16, #tpu.memory_space<vmem>>, %arg9: memref<8x128xf32, #tpu.memory_space<vmem>>, %arg10: memref<1x8x128xf32, #tpu.memory_space<vmem>>) attributes {dimension_semantics = [#tpu.dimension_semantics<parallel>], iteration_bounds = array<i64: 9>, scalar_prefetch = 0 : i64, scratch_operands = 0 : i64, tpu.core_type = #tpu.core_type<tc>, window_params = [{transform_indices = @transform_0, window_bounds = array<i64: 1, 128, 128>}, {transform_indices = @transform_1, window_bounds = array<i64: 1, 128, 128>}, {transform_indices = @transform_2, window_bounds = array<i64: 1, 8, 128>}, {transform_indices = @transform_3, window_bounds = array<i64: 1, 8, 1>}, {pipeline_mode = #tpu.pipeline_mode<synchronous>, transform_indices = @transform_4, window_bounds = array<i64: 128, 128>}, {pipeline_mode = #tpu.pipeline_mode<synchronous>, transform_indices = @transform_5, window_bounds = array<i64: 128, 128>}, {pipeline_mode = #tpu.pipeline_mode<synchronous>, transform_indices = @transform_6, window_bounds = array<i64: 128, 128>}, {pipeline_mode = #tpu.pipeline_mode<synchronous>, transform_indices = @transform_7, window_bounds = array<i64: 128, 128>}, {pipeline_mode = #tpu.pipeline_mode<synchronous>, transform_indices = @transform_8, window_bounds = array<i64: 8, 128>}, {transform_indices = @transform_9, window_bounds = array<i64: 1, 8, 128>}]} {
    %c0 = arith.constant 0 : index
    %c0_0 = arith.constant 0 : index
    %c0_1 = arith.constant 0 : index
    %0 = vector.load %arg1[%c0, %c0_0, %c0_1] : memref<1x128x128xbf16, #tpu.memory_space<vmem>>, vector<1x128x128xbf16>
    %1 = vector.shape_cast %0 : vector<1x128x128xbf16> to vector<128x128xbf16>
    %c0_2 = arith.constant 0 : index
    %c0_3 = arith.constant 0 : index
    %c0_4 = arith.constant 0 : index
    %2 = vector.load %arg2[%c0_2, %c0_3, %c0_4] : memref<1x128x128xbf16, #tpu.memory_space<vmem>>, vector<1x128x128xbf16>
    %3 = vector.shape_cast %2 : vector<1x128x128xbf16> to vector<128x128xbf16>
    %c0_5 = arith.constant 0 : index
    %c0_6 = arith.constant 0 : index
    %4 = vector.load %arg9[%c0_5, %c0_6] : memref<8x128xf32, #tpu.memory_space<vmem>>, vector<1x128xf32>
    %c0_7 = arith.constant 0 : index
    %c0_8 = arith.constant 0 : index
    %5 = vector.load %arg5[%c0_7, %c0_8] : memref<128x128xbf16, #tpu.memory_space<vmem>>, vector<128x128xbf16>
    %cst = arith.constant dense<0.000000e+00> : vector<128x128xf32>
    %6 = tpu.matmul %3, %5, %cst {dimension_numbers = #tpu.dot_dimension_numbers<[1], [0], [0], [1], [0, 0, 1, 1], [], []>} : vector<128x128xbf16>, vector<128x128xbf16>, vector<128x128xf32> -> vector<128x128xf32>
    %7 = arith.truncf %6 : vector<128x128xf32> to vector<128x128xbf16>
    %cst_9 = arith.constant dense<0.000000e+00> : vector<128x128xf32>
    %8 = tpu.matmul %1, %7, %cst_9 {dimension_numbers = #tpu.dot_dimension_numbers<[1], [0], [0], [1], [0, 0, 1, 1], [], []>} : vector<128x128xbf16>, vector<128x128xbf16>, vector<128x128xf32> -> vector<128x128xf32>
    %9 = vector.broadcast %4 : vector<1x128xf32> to vector<128x128xf32>
    %10 = arith.addf %8, %9 : vector<128x128xf32>
    %cst_10 = arith.constant 0.000000e+00 : f32
    %11 = vector.broadcast %cst_10 : f32 to vector<128x128xf32>
    %12 = arith.maximumf %10, %11 : vector<128x128xf32>
    %13 = arith.truncf %12 : vector<128x128xf32> to vector<128x128xbf16>
    %c1 = arith.constant 1 : index
    %c0_11 = arith.constant 0 : index
    %14 = vector.load %arg9[%c1, %c0_11] : memref<8x128xf32, #tpu.memory_space<vmem>>, vector<1x128xf32>
    %c0_12 = arith.constant 0 : index
    %c0_13 = arith.constant 0 : index
    %15 = vector.load %arg6[%c0_12, %c0_13] : memref<128x128xbf16, #tpu.memory_space<vmem>>, vector<128x128xbf16>
    %cst_14 = arith.constant dense<0.000000e+00> : vector<128x128xf32>
    %16 = tpu.matmul %13, %15, %cst_14 {dimension_numbers = #tpu.dot_dimension_numbers<[1], [0], [0], [1], [0, 0, 1, 1], [], []>} : vector<128x128xbf16>, vector<128x128xbf16>, vector<128x128xf32> -> vector<128x128xf32>
    %17 = arith.truncf %16 : vector<128x128xf32> to vector<128x128xbf16>
    %cst_15 = arith.constant dense<0.000000e+00> : vector<128x128xf32>
    %18 = tpu.matmul %1, %17, %cst_15 {dimension_numbers = #tpu.dot_dimension_numbers<[1], [0], [0], [1], [0, 0, 1, 1], [], []>} : vector<128x128xbf16>, vector<128x128xbf16>, vector<128x128xf32> -> vector<128x128xf32>
    %19 = vector.broadcast %14 : vector<1x128xf32> to vector<128x128xf32>
    %20 = arith.addf %18, %19 : vector<128x128xf32>
    %cst_16 = arith.constant 0.000000e+00 : f32
    %21 = vector.broadcast %cst_16 : f32 to vector<128x128xf32>
    %22 = arith.maximumf %20, %21 : vector<128x128xf32>
    %23 = arith.truncf %22 : vector<128x128xf32> to vector<128x128xbf16>
    %c2 = arith.constant 2 : index
    %c0_17 = arith.constant 0 : index
    %24 = vector.load %arg9[%c2, %c0_17] : memref<8x128xf32, #tpu.memory_space<vmem>>, vector<1x128xf32>
    %c0_18 = arith.constant 0 : index
    %c0_19 = arith.constant 0 : index
    %25 = vector.load %arg7[%c0_18, %c0_19] : memref<128x128xbf16, #tpu.memory_space<vmem>>, vector<128x128xbf16>
    %cst_20 = arith.constant dense<0.000000e+00> : vector<128x128xf32>
    %26 = tpu.matmul %23, %25, %cst_20 {dimension_numbers = #tpu.dot_dimension_numbers<[1], [0], [0], [1], [0, 0, 1, 1], [], []>} : vector<128x128xbf16>, vector<128x128xbf16>, vector<128x128xf32> -> vector<128x128xf32>
    %27 = arith.truncf %26 : vector<128x128xf32> to vector<128x128xbf16>
    %cst_21 = arith.constant dense<0.000000e+00> : vector<128x128xf32>
    %28 = tpu.matmul %1, %27, %cst_21 {dimension_numbers = #tpu.dot_dimension_numbers<[1], [0], [0], [1], [0, 0, 1, 1], [], []>} : vector<128x128xbf16>, vector<128x128xbf16>, vector<128x128xf32> -> vector<128x128xf32>
    %29 = vector.broadcast %24 : vector<1x128xf32> to vector<128x128xf32>
    %30 = arith.addf %28, %29 : vector<128x128xf32>
    %cst_22 = arith.constant 0.000000e+00 : f32
    %31 = vector.broadcast %cst_22 : f32 to vector<128x128xf32>
    %32 = arith.maximumf %30, %31 : vector<128x128xf32>
    %33 = arith.truncf %32 : vector<128x128xf32> to vector<128x128xbf16>
    %c0_23 = arith.constant 0 : index
    %c0_24 = arith.constant 0 : index
    %c0_25 = arith.constant 0 : index
    %34 = vector.load %arg3[%c0_23, %c0_24, %c0_25] : memref<1x8x128xbf16, #tpu.memory_space<vmem>>, vector<1x8x128xbf16>
    %35 = vector.shape_cast %34 : vector<1x8x128xbf16> to vector<8x128xbf16>
    %cst_26 = arith.constant dense<0.000000e+00> : vector<8x128xf32>
    %36 = tpu.matmul %35, %33, %cst_26 {dimension_numbers = #tpu.dot_dimension_numbers<[1], [0], [0], [1], [0, 0, 1, 1], [], []>} : vector<8x128xbf16>, vector<128x128xbf16>, vector<8x128xf32> -> vector<8x128xf32>
    %c0_27 = arith.constant 0 : index
    %c0_28 = arith.constant 0 : index
    %c0_29 = arith.constant 0 : index
    %37 = vector.load %arg4[%c0_27, %c0_28, %c0_29] : memref<1x8x1xf32, #tpu.memory_space<vmem>>, vector<1x8x1xf32>
    %38 = vector.shape_cast %37 : vector<1x8x1xf32> to vector<8x1xf32>
    %39 = vector.broadcast %38 : vector<8x1xf32> to vector<8x128xf32>
    %40 = arith.mulf %36, %39 : vector<8x128xf32>
    %41 = arith.truncf %40 : vector<8x128xf32> to vector<8x128xbf16>
    %c0_30 = arith.constant 0 : index
    %c0_31 = arith.constant 0 : index
    %42 = vector.load %arg8[%c0_30, %c0_31] : memref<128x128xbf16, #tpu.memory_space<vmem>>, vector<128x128xbf16>
    %cst_32 = arith.constant dense<0.000000e+00> : vector<8x128xf32>
    %43 = tpu.matmul %41, %42, %cst_32 {dimension_numbers = #tpu.dot_dimension_numbers<[1], [0], [0], [1], [0, 0, 1, 1], [], []>} : vector<8x128xbf16>, vector<128x128xbf16>, vector<8x128xf32> -> vector<8x128xf32>
    %c3 = arith.constant 3 : index
    %c0_33 = arith.constant 0 : index
    %44 = vector.load %arg9[%c3, %c0_33] : memref<8x128xf32, #tpu.memory_space<vmem>>, vector<1x128xf32>
    %45 = vector.broadcast %44 : vector<1x128xf32> to vector<8x128xf32>
    %46 = arith.addf %43, %45 : vector<8x128xf32>
    %c0_34 = arith.constant 0 : index
    %c0_35 = arith.constant 0 : index
    %c0_36 = arith.constant 0 : index
    %47 = vector.load %arg10[%c0_34, %c0_35, %c0_36] : memref<1x8x128xf32, #tpu.memory_space<vmem>>, vector<1x8x128xf32>
    %48 = vector.shape_cast %47 : vector<1x8x128xf32> to vector<8x128xf32>
    %49 = vector.shape_cast %46 : vector<8x128xf32> to vector<1x8x128xf32>
    tpu.vector_store %arg10[%c0_34, %c0_35, %c0_36], %49 {strides = array<i32>} : memref<1x8x128xf32, #tpu.memory_space<vmem>>, vector<1x8x128xf32>,
    return
  }
  func.func @transform_0(%arg0: i32) -> (i32, i32, i32) {
    %c0_i32 = arith.constant 0 : i32
    %c0_i32_0 = arith.constant 0 : i32
    %c0_i32_1 = arith.constant 0 : i32
    return %arg0, %c0_i32, %c0_i32_0 : i32, i32, i32
  }
  func.func @transform_1(%arg0: i32) -> (i32, i32, i32) {
    %c0_i32 = arith.constant 0 : i32
    %c0_i32_0 = arith.constant 0 : i32
    %c0_i32_1 = arith.constant 0 : i32
    return %arg0, %c0_i32, %c0_i32_0 : i32, i32, i32
  }
  func.func @transform_2(%arg0: i32) -> (i32, i32, i32) {
    %c0_i32 = arith.constant 0 : i32
    %c0_i32_0 = arith.constant 0 : i32
    %c0_i32_1 = arith.constant 0 : i32
    return %arg0, %c0_i32, %c0_i32_0 : i32, i32, i32
  }
  func.func @transform_3(%arg0: i32) -> (i32, i32, i32) {
    %c0_i32 = arith.constant 0 : i32
    %c0_i32_0 = arith.constant 0 : i32
    %c0_i32_1 = arith.constant 0 : i32
    return %arg0, %c0_i32, %c0_i32_0 : i32, i32, i32
  }
  func.func @transform_4(%arg0: i32) -> (i32, i32) {
    %c0_i32 = arith.constant 0 : i32
    %c0_i32_0 = arith.constant 0 : i32
    %c0_i32_1 = arith.constant 0 : i32
    return %c0_i32, %c0_i32_0 : i32, i32
  }
  func.func @transform_5(%arg0: i32) -> (i32, i32) {
    %c0_i32 = arith.constant 0 : i32
    %c0_i32_0 = arith.constant 0 : i32
    %c0_i32_1 = arith.constant 0 : i32
    return %c0_i32, %c0_i32_0 : i32, i32
  }
  func.func @transform_6(%arg0: i32) -> (i32, i32) {
    %c0_i32 = arith.constant 0 : i32
    %c0_i32_0 = arith.constant 0 : i32
    %c0_i32_1 = arith.constant 0 : i32
    return %c0_i32, %c0_i32_0 : i32, i32
  }
  func.func @transform_7(%arg0: i32) -> (i32, i32) {
    %c0_i32 = arith.constant 0 : i32
    %c0_i32_0 = arith.constant 0 : i32
    %c0_i32_1 = arith.constant 0 : i32
    return %c0_i32, %c0_i32_0 : i32, i32
  }
  func.func @transform_8(%arg0: i32) -> (i32, i32) {
    %c0_i32 = arith.constant 0 : i32
    %c0_i32_0 = arith.constant 0 : i32
    %c0_i32_1 = arith.constant 0 : i32
    return %c0_i32, %c0_i32_0 : i32, i32
  }
  func.func @transform_9(%arg0: i32) -> (i32, i32, i32) {
    %c0_i32 = arith.constant 0 : i32
    %c0_i32_0 = arith.constant 0 : i32
    %c0_i32_1 = arith.constant 0 : i32
    return %arg0, %c0_i32, %c0_i32_0 : i32, i32, i32
  }
}

</mosaic_0001>

<bundles_post_ra>
// kernel: tpu_custom_call.1
= control target key start
LH: loop header
LB: loop body
LE: loop exit
PB: predicated region body
PF: predicated region fallthrough
CT: control target
= control target key end

     0   :  { %s3164_s0 = inlined_call_operand.hbm [shape: bf16[9,128,128], index: 0, kind: input, shape index: {}]   ;;  %s3165_s1 = inlined_call_operand.hbm [shape: bf16[9,128,128], index: 1, kind: input, shape index: {}]   ;;  %s3166_s2 = inlined_call_operand.hbm [shape: bf16[9,8,128], index: 2, kind: input, shape index: {}]   ;;  %s3167_s3 = inlined_call_operand.vmem [shape: f32[9,8,1], index: 3, kind: input, shape index: {}]   ;;  %s3168_s4 = inlined_call_operand.vmem [shape: bf16[128,128], index: 4, kind: input, shape index: {}]   ;;  %s3169_s5 = inlined_call_operand.hbm [shape: bf16[128,128], index: 5, kind: input, shape index: {}]   ;;  %s3170_s6 = inlined_call_operand.hbm [shape: bf16[128,128], index: 6, kind: input, shape index: {}]   ;;  %s3171_s7 = inlined_call_operand.hbm [shape: bf16[128,128], index: 7, kind: input, shape index: {}]   ;;  %s3172_s8 = inlined_call_operand.vmem [shape: f32[8,128], index: 8, kind: input, shape index: {}]   ;;  %s3173_s9 = inlined_call_operand.hbm [shape: f32[9,8,128], index: 9, kind: output, shape index: {}]  }
   0x1   :  { %3198 = sst [smem:[#allocation25_spill]] %s3165_s1 }
   0x2   :  { %3199 = sst [smem:[#allocation26_spill]] %s3167_s3 }
   0x3   :  { %3200 = sst [smem:[#allocation27_spill]] %s3169_s5 }
   0x4   :  { %3201 = sst [smem:[#allocation28_spill]] %s3172_s8 }
   0x5   :  { %3202 = sst [smem:[#allocation29_spill]] %s3173_s9 }
   0x6   :  { %14 = vsyncpa [#allocation3], 0 }
   0x7   :  { %16 = vsyncpa [#allocation3 + $0x1], 0 }
   0x8   :  { %17 = vsyncpa [#allocation6], 0 }
   0x9   :  { %19 = vsyncpa [#allocation6 + $0x1], 0 }
   0xa   :  { %20 = vsyncpa [#allocation9], 0 }
   0xb   :  { %21 = vsyncpa [#allocation12], 0 }
   0xc   :  { %22 = vsyncpa [#allocation4], 0 }
   0xd   :  { %24 = vsyncpa [#allocation4 + $0x1], 0  ;;  %s2711_s30 = smov 0   ;;  %s2713_s10 = smov 0  }
   0xe   :  { %s2715_s11 = smov 0   ;;  %s2717_s12 = smov 0  }
   0xf LB: > { %3203 = sst [smem:[#allocation19_spill]] %s2635_s30  ;;  %s2732_s13 = sadd.s32 4294967295, %s2647_s12   ;;  %s2647_s12 = sphi %s2717_s12, %s3245_s12   ;;  %s2643_s11 = sphi %s2715_s11, %s3247_s11   ;;  %s2639_s10 = sphi %s2713_s10, %s3249_s10   ;;  %s2635_s30 = sphi %s2711_s30, %s3248_s30  }
  0x10   : > { %3204 = sst [smem:[#allocation20_spill]] %s2643_s11  ;;  %s1827_s14 = sadd.s32 4294967294, %s2647_s12  }
  0x11   : > { %s2736_s15 = sadd.s32 1, %s2647_s12   ;;  %s37_s16 = sadd.s32 1, %s2643_s11 }
  0x12   : > { %3205 = sst [smem:[#allocation21_spill]] %s2736_s15  ;;  %s34_s17 = ssub.s32 %s2647_s12, %s2736_s15 }
  0x13   : > { %p44_p0 = scmp.ne.s32.totalorder %s2643_s11, %s2639_s10  ;;  %p35_p1 = scmp.eq.s32.totalorder %s34_s17, 0 }
  0x14   : > { %p45_p2 = scmp.eq.s32.totalorder %s2647_s12, 0  ;;  %p50_p3 = scmp.ne.s32.totalorder %s2639_s10, %s2635_s30 }
  0x15   : > { %p3177_p4 = scmp.eq.s32.totalorder %s2732_s13, 0  ;;  %p257_p7 = scmp.eq.s32.totalorder %s2732_s13, 8 }
  0x16   : > { %s2748_s18 = scalar_select %p35_p1, %s2643_s11, %s37_s16  }
  0x17   : > { %p2750_p5 = por %p45_p2, %p44_p0  ;;  %p2756_p6 = por %p3177_p4, %p50_p3 }
  0x18   : > { %3206 = sst [smem:[#allocation22_spill]] %s2748_s18  ;;  %p263_p8 = scmp.eq.s32.totalorder %s1827_s14, 8 }
  0x19   : > { %s3207_s19 = scalar_select %p2750_p5, 1, 0 }
  0x1a   : > { %s3208_s20 = scalar_select %p2756_p6, 1, 0 }
  0x1b   : > { %p1828_p9 = scmp.ge.s32.totalorder %s2647_s12, 1  ;;  %p270_p10 = scmp.lt.s32.totalorder %s2647_s12, 10 }
  0x1c   : > { %p2763_p11 = por %p257_p7, %p44_p0  ;;  %p2767_p12 = por %p263_p8, %p50_p3 }
  0x1d   : > { %p2771_p13 = pnand %p1828_p9, %p270_p10  ;;  %s2649_s24 = smov [#allocation8]  }
  0x1e   : > { %s3209_s21 = scalar_select %p2763_p11, 1, 0 }
  0x1f   : > { %s3211_s22 = scalar_select %p2767_p12, 1, 0 }
  0x20   : > { %3210 = sst [smem:[#allocation23_spill]] %s3209_s21  ;;  %p2274_p1 = pneg %p2771_p13 }
  0x21   : > { %3212 = sst [smem:[#allocation24_spill]] %s3211_s22  ;;  %s285_s25 = sshll.u32 %s2649_s24, 4  ;;  %s286_s25 = int_to_ptr.vmem [resolvable:$true] %s285_s25 }
  0x22   : > { %s3213_s23 = scalar_select %p2771_p13, 1, 0 }
  0x23   : > { %p2779_p2 = pnand %p2274_p1, %p3177_p4  ;;  %s2785_s27 = sand.u32 1, %s2643_s11  }
  0x24   : > { %s3215_s5 = sld [smem:[#allocation27_spill]] }
  0x25   : > { %s3214_s26 = scalar_select %p2779_p2, 1, 0 }
  0x26   : > { %p2796_p7 = pneg %p2779_p2 }
  0x28   : > { %s3216_s24 = scalar_select %p2796_p7, 1, 0 }
  0x2a   : > { %s2395_s16 = scalar_lea.hbm %s3215_s5, 1024 }
  0x2b   : > { %p2396_p3 = scmp.ne.s32.totalorder %s3215_s5, %s2395_s16  ;;  %p2402_p10 = scmp.lt.u32.totalorder %s2395_s16, %s3215_s5 }
  0x2d   : > { %p2398_p8 = pnand %p2796_p7, %p2396_p3 }
  0x2f   : > { %p2399_p9 = pneg %p2398_p8 }
  0x31   : > { %p2404_p1 = pnand %p2402_p10, %p2399_p9 }
  0x33   : > { %2407 = shalt.err (!%p2404_p1)
}
  0x34   : > { %s2408_s29 = scalar_lea.vmem %s286_s25, 1024  ;;  %p2416_p11 = scmp.lt.s32.totalorder %s286_s25, %s286_s25 }
  0x35   : > { %p2409_p4 = scmp.ne.s32.totalorder %s286_s25, %s2408_s29  ;;  %p2417_p6 = scmp.lt.s32.totalorder %s2408_s29, %s2408_s29 }
  0x37   : > { %p2411_p0 = pnand %p2409_p4, %p2796_p7  ;;  %p2418_p13 = por %p2417_p6, %p2416_p11 }
  0x39   : > { %p2412_p12 = pneg %p2411_p0 }
  0x3b   : > { %p2419_p5 = pnand %p2418_p13, %p2412_p12 }
  0x3d   : > { %2422 = shalt.err (!%p2419_p5)
}
  0x3e   : > { %s3184_s18 = smov 64   ;;  %s2651_s11 = smov 4  }
  0x3f   : > { %2277 = dma.hbm_to_vmem [thread:$0]  (!%p2779_p2), %s3215_s5, 1024, %s286_s25, [#allocation9], %s3184_s18, %s3184_s18, %s2651_s11  }
  0x40   : > { %s3186_s16 = sshll.u32 %s2647_s12, 10  ;;  %p3217_p4 = scmp.ne.s32.totalorder %s3207_s19, 0 }
  0x41   : > { %p3218_p5 = scmp.lt.s32.totalorder %s2647_s12, 9  ;;  %s349_s29 = sand.u32 1, %s2647_s12  }
  0x42   : > { %s3220_s1 = sld [smem:[#allocation25_spill]]  ;;  %s3221_s9 = sshll.u32 %s2785_s27, 6 }
  0x43   : > { %p2820_p6 = pnand %p3218_p5, %p3217_p4  ;;  %s353_s25 = scalar_lea.vmem [#allocation5], %s3221_s9 }
  0x44   : > { %s360_s19 = sshll.u32 %s353_s25, 4  ;;  %s2836_s15 = scalar_lea.sflag [#allocation6], %s349_s29  ;;  %s2834_s19 = int_to_ptr.vmem [resolvable:$true] %s360_s19 }
  0x45   : > { %s3219_s17 = scalar_select %p2820_p6, 1, 0 }
  0x46   : > { %p2842_p12 = pneg %p2820_p6 }
  0x48   : > { %s2830_s30 = scalar_lea.hbm %s3220_s1, %s3186_s16  ;;  %s2428_s9 = scalar_lea.hbm %s3220_s1, 9216 }
  0x49   : > { %s2423_s14 = scalar_lea.hbm %s2830_s30, 1024  ;;  %p2429_p3 = scmp.lt.u32.totalorder %s2830_s30, %s3220_s1 }
  0x4a   : > { %p2424_p11 = scmp.ne.s32.totalorder %s2830_s30, %s2423_s14  ;;  %p2430_p8 = scmp.lt.u32.totalorder %s2428_s9, %s2423_s14 }
  0x4b   : > { %s3222_s18 = scalar_select %p2842_p12, 1, 0 }
  0x4c   : > { %p2426_p13 = pnand %p2842_p12, %p2424_p11  ;;  %p2431_p9 = por %p2430_p8, %p2429_p3 }
  0x4d   : > { %p2432_p10 = scmp.lt.u32.totalorder %s2423_s14, %s2830_s30 }
  0x4e   : > { %p2427_p0 = pneg %p2426_p13 }
  0x4f   : > { %p2433_p1 = por %p2432_p10, %p2431_p9 }
  0x51   : > { %p2434_p4 = pnand %p2433_p1, %p2427_p0 }
  0x53   : > { %2437 = shalt.err (!%p2434_p4)
}
  0x54   : > { %s2438_s29 = scalar_lea.vmem %s2834_s19, 1024  ;;  %s2652_s22 = smov [#allocation5]  }
  0x55   : > { %p2439_p5 = scmp.ne.s32.totalorder %s2834_s19, %s2438_s29  ;;  %s2443_s28 = sshll.u32 %s2652_s22, 4  ;;  %s2444_s28 = int_to_ptr.vmem [resolvable:$false] %s2443_s28 }
  0x56   : > { %s2445_s16 = scalar_lea.vmem %s2444_s28, 2048  ;;  %p2446_p2 = scmp.lt.s32.totalorder %s2834_s19, %s2444_s28 }
  0x57   : > { %p2441_p11 = pnand %p2439_p5, %p2842_p12  ;;  %p2447_p7 = scmp.lt.s32.totalorder %s2445_s16, %s2438_s29 }
  0x59   : > { %p2442_p13 = pneg %p2441_p11  ;;  %p2448_p3 = por %p2447_p7, %p2446_p2 }
  0x5b   : > { %p2449_p8 = pnand %p2448_p3, %p2442_p13 }
  0x5d   : > { %2452 = shalt.err (!%p2449_p8)
}
  0x5e   : > { %s3223_s14 = smov 64   ;;  %s2653_s9 = smov [#allocation10]  }
  0x5f   : > { %2290 = dma.hbm_to_vmem [thread:$0]  (!%p2820_p6), %s2830_s30, 1024, %s2834_s19, %s2836_s15, %s3223_s14, %s3223_s14, %s2651_s11  }
  0x60   : > { %s298_s25 = sshll.u32 %s2653_s9, 4  ;;  %s2654_s22 = smov [#allocation11]   ;;  %s299_s25 = int_to_ptr.vmem [resolvable:$true] %s298_s25 }
  0x61   : > { %s311_s1 = sshll.u32 %s2654_s22, 4  ;;  %s2453_s16 = scalar_lea.hbm %s3170_s6, 1024  ;;  %s312_s1 = int_to_ptr.vmem [resolvable:$true] %s311_s1 }
  0x62   : > { %p2454_p2 = scmp.ne.s32.totalorder %s3170_s6, %s2453_s16  ;;  %p3224_p7 = scmp.ne.s32.totalorder %s3216_s24, 0 }
  0x63   : > { %p2460_p10 = scmp.lt.u32.totalorder %s2453_s16, %s3170_s6 }
  0x64   : > { %p2456_p0 = pnand %p2454_p2, %p3224_p7 }
  0x66   : > { %p2457_p9 = pneg %p2456_p0 }
  0x68   : > { %p2462_p1 = pnand %p2460_p10, %p2457_p9 }
  0x6a   : > { %2465 = shalt.err (!%p2462_p1)
}
  0x6b   : > { %s2466_s30 = scalar_lea.vmem %s299_s25, 1024  ;;  %p2474_p13 = scmp.lt.s32.totalorder %s299_s25, %s299_s25 }
  0x6c   : > { %p2467_p4 = scmp.ne.s32.totalorder %s299_s25, %s2466_s30  ;;  %p2475_p3 = scmp.lt.s32.totalorder %s2466_s30, %s2466_s30 }
  0x6e   : > { %p2469_p5 = pnand %p2467_p4, %p3224_p7  ;;  %p2476_p8 = por %p2475_p3, %p2474_p13 }
  0x70   : > { %p2470_p11 = pneg %p2469_p5 }
  0x72   : > { %p2477_p6 = pnand %p2476_p8, %p2470_p11 }
  0x74   : > { %2480 = shalt.err (!%p2477_p6)
}
  0x75   : > { %p3225_p2 = scmp.ne.s32.totalorder %s3214_s26, 0  ;;  %s2481_s19 = scalar_lea.hbm %s3171_s7, 1024 }
  0x76   : > { %p2482_p0 = scmp.ne.s32.totalorder %s3171_s7, %s2481_s19  ;;  %p2488_p10 = scmp.lt.u32.totalorder %s2481_s19, %s3171_s7 }
  0x77   : > { %2280 = dma.hbm_to_vmem [thread:$0]  (!%p3225_p2), %s3170_s6, 1024, %s299_s25, [#allocation9], %s3223_s14, %s3223_s14, %s2651_s11  }
  0x78   : > { %p2484_p6 = pnand %p2482_p0, %p3224_p7 }
  0x7a   : > { %p2485_p9 = pneg %p2484_p6 }
  0x7c   : > { %p2490_p1 = pnand %p2488_p10, %p2485_p9 }
  0x7e   : > { %2493 = shalt.err (!%p2490_p1)
}
  0x7f   : > { %s2494_s16 = scalar_lea.vmem %s312_s1, 1024  ;;  %p2502_p13 = scmp.lt.s32.totalorder %s312_s1, %s312_s1 }
  0x80   : > { %p2495_p4 = scmp.ne.s32.totalorder %s312_s1, %s2494_s16  ;;  %p2503_p3 = scmp.lt.s32.totalorder %s2494_s16, %s2494_s16 }
  0x82   : > { %p2497_p5 = pnand %p2495_p4, %p3224_p7  ;;  %p2504_p8 = por %p2503_p3, %p2502_p13 }
  0x84   : > { %p2498_p11 = pneg %p2497_p5 }
  0x86   : > { %p2505_p12 = pnand %p2504_p8, %p2498_p11 }
  0x88   : > { %2508 = shalt.err (!%p2505_p12)
}
  0x89   : > { %2283 = dma.hbm_to_vmem [thread:$0]  (!%p3225_p2), %s3171_s7, 1024, %s312_s1, [#allocation12], %s3223_s14, %s3223_s14, %s2651_s11  }
  0x8a   : > { %s3226_s24 = sshll.u32 %s2647_s12, 10  ;;  %s3227_s21 = sshll.u32 %s2785_s27, 6 }
  0x8b   : > { %s2916_s8 = scalar_lea.hbm %s3164_s0, %s3226_s24  ;;  %s332_s26 = scalar_lea.vmem [#allocation2], %s3227_s21 }
  0x8c   : > { %s339_s19 = sshll.u32 %s332_s26, 4  ;;  %s1839_s9 = sshll.u32 %s2785_s27, 2  ;;  %s2921_s19 = int_to_ptr.vmem [resolvable:$true] %s339_s19 }
  0x8d   : > { %s329_s22 = scalar_lea.sflag [#allocation3], %s2785_s27  ;;  %s2509_s28 = scalar_lea.hbm %s2916_s8, 1024 }
  0x8e   : > { %p2510_p12 = scmp.ne.s32.totalorder %s2916_s8, %s2509_s28  ;;  %p3228_p7 = scmp.ne.s32.totalorder %s3222_s18, 0 }
  0x8f   : > { %s2514_s16 = scalar_lea.hbm %s3164_s0, 9216  ;;  %p2515_p6 = scmp.lt.u32.totalorder %s2916_s8, %s3164_s0 }
  0x90   : > { %p2512_p2 = pnand %p2510_p12, %p3228_p7  ;;  %p2516_p9 = scmp.lt.u32.totalorder %s2514_s16, %s2509_s28 }
  0x91   : > { %p2518_p1 = scmp.lt.u32.totalorder %s2509_s28, %s2916_s8 }
  0x92   : > { %p2513_p0 = pneg %p2512_p2  ;;  %p2517_p10 = por %p2516_p9, %p2515_p6 }
  0x94   : > { %p2519_p4 = por %p2518_p1, %p2517_p10 }
  0x96   : > { %p2520_p5 = pnand %p2519_p4, %p2513_p0 }
  0x98   : > { %2523 = shalt.err (!%p2520_p5)
}
  0x99   : > { %s2524_s24 = scalar_lea.vmem %s2921_s19, 1024  ;;  %s2655_s3 = smov [#allocation2]  }
  0x9a   : > { %p2525_p11 = scmp.ne.s32.totalorder %s2921_s19, %s2524_s24  ;;  %s2529_s5 = sshll.u32 %s2655_s3, 4  ;;  %s2530_s5 = int_to_ptr.vmem [resolvable:$false] %s2529_s5 }
  0x9b   : > { %s2531_s21 = scalar_lea.vmem %s2530_s5, 2048  ;;  %p2532_p8 = scmp.lt.s32.totalorder %s2921_s19, %s2530_s5 }
  0x9c   : > { %p2527_p13 = pnand %p2525_p11, %p3228_p7  ;;  %p2533_p12 = scmp.lt.s32.totalorder %s2531_s21, %s2524_s24 }
  0x9e   : > { %p2528_p3 = pneg %p2527_p13  ;;  %p2534_p2 = por %p2533_p12, %p2532_p8 }
  0xa0   : > { %p2535_p6 = pnand %p2534_p2, %p2528_p3 }
  0xa2   : > { %2538 = shalt.err (!%p2535_p6)
}
  0xa3   : > { %p3229_p0 = scmp.ne.s32.totalorder %s3219_s17, 0  ;;  %s1840_s26 = sshll.u32 %s2647_s12, 6 }
  0xa4   : > { %s374_s28 = scalar_lea.vmem [#allocation7], %s1839_s9  ;;  %s379_s25 = scalar_lea.hbm %s3166_s2, %s1840_s26 }
  0xa5   : > { %2287 = dma.hbm_to_vmem [thread:$0]  (!%p3229_p0), %s2916_s8, 1024, %s2921_s19, %s329_s22, %s3223_s14, %s3223_s14, %s2651_s11  }
  0xa6   : > { %s381_s1 = sshll.u32 %s374_s28, 4  ;;  %s2539_s30 = scalar_lea.hbm %s379_s25, 64  ;;  %s382_s1 = int_to_ptr.vmem [resolvable:$true] %s381_s1 }
  0xa7   : > { %p2540_p9 = scmp.ne.s32.totalorder %s379_s25, %s2539_s30  ;;  %s2544_s5 = scalar_lea.hbm %s3166_s2, 576 }
  0xa8   : > { %p2545_p4 = scmp.lt.u32.totalorder %s379_s25, %s3166_s2  ;;  %p2546_p5 = scmp.lt.u32.totalorder %s2544_s5, %s2539_s30 }
  0xa9   : > { %p2542_p10 = pnand %p2540_p9, %p3228_p7  ;;  %p2548_p13 = scmp.lt.u32.totalorder %s2539_s30, %s379_s25 }
  0xaa   : > { %p2547_p11 = por %p2546_p5, %p2545_p4 }
  0xab   : > { %p2543_p1 = pneg %p2542_p10 }
  0xac   : > { %p2549_p3 = por %p2548_p13, %p2547_p11 }
  0xae   : > { %p2550_p8 = pnand %p2549_p3, %p2543_p1 }
  0xb0   : > { %2553 = shalt.err (!%p2550_p8)
}
  0xb1   : > { %s2554_s27 = scalar_lea.vmem %s382_s1, 64  ;;  %s2656_s14 = smov [#allocation7]  }
  0xb2   : > { %p2555_p12 = scmp.ne.s32.totalorder %s382_s1, %s2554_s27  ;;  %s2559_s8 = sshll.u32 %s2656_s14, 4  ;;  %s2560_s8 = int_to_ptr.vmem [resolvable:$false] %s2559_s8 }
  0xb3   : > { %s2561_s19 = scalar_lea.vmem %s2560_s8, 128  ;;  %p2562_p9 = scmp.lt.s32.totalorder %s382_s1, %s2560_s8 }
  0xb4   : > { %p2557_p2 = pnand %p2555_p12, %p3228_p7  ;;  %p2563_p10 = scmp.lt.s32.totalorder %s2561_s19, %s2554_s27 }
  0xb6   : > { %p2558_p6 = pneg %p2557_p2  ;;  %p2564_p0 = por %p2563_p10, %p2562_p9 }
  0xb8   : > { %p2565_p4 = pnand %p2564_p0, %p2558_p6 }
  0xba   : > { %2568 = shalt.err (!%p2565_p4)
}
  0xbb   : > { %p3230_p5 = scmp.ne.s32.totalorder %s3219_s17, 0  ;;  %p3231_p1 = scmp.ne.s32.totalorder %s3213_s23, 0 }
  0xbc   : > { %s2972_s18 = sand.u32 (!%p3231_p1), 1, %s2639_s10   ;;  %p3232_p7 = scmp.ne.s32.totalorder (!%p3231_p1), %s3208_s20, 0 }
  0xbd   : > { %2293 = dma.hbm_to_vmem [thread:$0]  (!%p3230_p5), %s379_s25, 64, %s382_s1, %s2836_s15  }
  0xbe   : > { %397 = sbr.rel (%p3231_p1) target bundleno = 2127 (0x84f), region = 56  ;;  %s1842_s9 = sshll.u32 (!%p3231_p1), %s2972_s18, 6 }
  0xbf   : > { %s400_s22 = scalar_lea.sflag (!%p3231_p1), [#allocation3], %s2972_s18  ;;  %s2976_s26 = scalar_lea.vmem (!%p3231_p1), [#allocation2], %s1842_s9 }
  0xc5   : > { %2614 = dma.done.wait (%p3232_p7), %s400_s22, 1024  }
  0xc6   : > { %2616 = vsyncadd (%p3232_p7), %s400_s22, 4294966272  ;;  %s408_s17 = sand.u32 1, %s2732_s13   ;;  %s2983_s15 = scalar_lea.vmem [#allocation5], %s1842_s9 }
  0xc7   : > { %s409_s23 = scalar_lea.sflag [#allocation6], %s408_s17 }
  0xc8   : > { %2618 = dma.done.wait (%p3232_p7), %s409_s23, 1088  }
  0xc9   : > { %2620 = vsyncadd (%p3232_p7), %s409_s23, 4294966208  ;;  %s1844_s28 = sshll.u32 %s2972_s18, 2  ;;  %p3233_p0 = scmp.eq.s32.totalorder %s2732_s13, 0 }
  0xca   : > { %s2990_s1 = scalar_lea.vmem [#allocation7], %s1844_s28 }
  0xcb   : > { %2622 = dma.done.wait (%p3233_p0), [#allocation9], 2048   ;;  %p3234_p11 = pmov %p3233_p0 }
  0xcc   : > { %p3235_p13 = pmov %p3233_p0 }
  0xcd   : > { %2624 = vsyncadd (%p3234_p11), [#allocation9], 4294965248 }
  0xce   : > { %2626 = dma.done.wait (%p3235_p13), [#allocation12], 1024   ;;  %p3236_p3 = pmov %p3233_p0 }
  0xcf   : > { %v2347_v0 = vld [vmem:[%s3168_s4] sm:$0xff]   ;;  %v2348_v1 = vld [vmem:[%s3168_s4 + $0x8] sm:$0xff]   ;;  %v2349_v2 = vld [vmem:[%s3168_s4 + $0x10] sm:$0xff]   ;;  %vm2658_vm0 = vmmov 0   ;;  %p482_p8 = scmp.lt.s32.totalorder %s2732_s13, 8  ;;  %s3238_s30 = sld [smem:[#allocation26_spill]] }
  0xd0   : > { %2628 = vsyncadd (%p3236_p3), [#allocation12], 4294966272  ;;  %2022 = vmatprep.subr.bf16.mxu0 %v2347_v0  ;;  %v2350_v3 = vld [vmem:[%s3168_s4 + $0x18] sm:$0xff]   ;;  %v2355_v4 = vld [vmem:[%s2983_s15] sm:$0xff]   ;;  %s1848_s21 = sshll.u32 %s2972_s18, 3  ;;  %s3239_s14 = sld [smem:[#allocation23_spill]] }
  0xd1   : > { %2023 = vmatpush3.bf16.msra.mxu0 %v2347_v0  ;;  %2038 = vmatprep.mubr.bf16.mxu0 %v2355_v4  ;;  %v2351_v5 = vld [vmem:[%s3168_s4 + $0x20] sm:$0xff]   ;;  %v2352_v6 = vld [vmem:[%s3168_s4 + $0x28] sm:$0xff]   ;;  %v2353_v7 = vld [vmem:[%s3168_s4 + $0x30] sm:$0xff]   ;;  %s483_s29 = scalar_select %p482_p8, %s2732_s13, 8 }
  0xd2   : > { %2024 = vmatprep.subr.bf16.mxu0 %v2348_v1  ;;  %v2354_v8 = vld [vmem:[%s3168_s4 + $0x38] sm:$0xff]   ;;  %v2356_v9 = vld [vmem:[%s2983_s15 + $0x8] sm:$0xff]   ;;  %v2357_v10 = vld [vmem:[%s2983_s15 + $0x10] sm:$0xff]   ;;  %s1903_s8 = sshll.u32 %s2732_s13, 7  ;;  %s3240_s17 = sld [smem:[#allocation29_spill]] }
  0xd3   : > { %v2358_v11 = vld [vmem:[%s2983_s15 + $0x18] sm:$0xff]   ;;  %v2359_v12 = vld [vmem:[%s2983_s15 + $0x20] sm:$0xff]   ;;  %v2360_v13 = vld [vmem:[%s2983_s15 + $0x28] sm:$0xff]   ;;  %s1849_s16 = sshll.u32 %s483_s29, 3  ;;  %s2660_s28 = smov [#allocation13]  }
  0xd4   : > { %v2361_v14 = vld [vmem:[%s2983_s15 + $0x30] sm:$0xff]   ;;  %v2362_v15 = vld [vmem:[%s2983_s15 + $0x38] sm:$0xff]   ;;  %v3033_v16 = vld [vmem:[%s2976_s26] sm:$0xff]   ;;  %s3237_s15 = sld [smem:[#allocation28_spill]]  ;;  %s2573_s29 = sshll.u32 %s2660_s28, 4  ;;  %s2574_s29 = int_to_ptr.vmem [resolvable:$false] %s2573_s29 }
  0xd5   : > { %2025 = vmatpush3.bf16.msra.mxu0 %v2348_v1  ;;  %2070 = vmatprep.mubr.bf16.mxu1 %v3033_v16  ;;  %v2371_v17 = vld [vmem:[#allocation8] sm:$0xff]   ;;  %v2372_v18 = vld [vmem:[#allocation8 + $0x8] sm:$0xff]   ;;  %v2373_v19 = vld [vmem:[#allocation8 + $0x10] sm:$0xff]   ;;  %s485_s24 = scalar_lea.vmem %s3238_s30, %s1849_s16  ;;  %s2575_s16 = scalar_lea.vmem %s2574_s29, 256 }
  0xd6   : > { %2026 = vmatprep.subr.bf16.mxu0 %v2349_v2  ;;  %v2374_v20 = vld [vmem:[#allocation8 + $0x18] sm:$0xff]   ;;  %v2375_v21 = vld [vmem:[#allocation8 + $0x20] sm:$0xff]   ;;  %v2376_v22 = vld [vmem:[#allocation8 + $0x28] sm:$0xff]   ;;  %p3241_p2 = scmp.ne.s32.totalorder %s3239_s14, 0 }
  0xd7   : > { %v3037_v47 = vld [vmem:[%s2976_s26 + $0x8] sm:$0xff]   ;;  %v3040_v48 = vld [vmem:[%s2976_s26 + $0x10] sm:$0xff]   ;;  %v3045_v49 = vld [vmem:[%s2976_s26 + $0x18] sm:$0xff]  }
  0xd8   : > { %v3048_v50 = vld [vmem:[%s2976_s26 + $0x20] sm:$0xff]   ;;  %v3053_v51 = vld [vmem:[%s2976_s26 + $0x28] sm:$0xff]   ;;  %v3056_v52 = vld [vmem:[%s2976_s26 + $0x30] sm:$0xff]   ;;  %s3121_s23 = scalar_lea.hbm %s3240_s17, %s1903_s8 }
  0xd9   : > { %2027 = vmatpush3.bf16.msra.mxu0 %v2349_v2  ;;  %v3061_v53 = vld [vmem:[%s2976_s26 + $0x38] sm:$0xff]   ;;  %v2378_v55 = vld [vmem:[#allocation8 + $0x38] sm:$0xff]   ;;  %s1660_s26 = scalar_lea.sflag [#allocation4], %s2972_s18 }
  0xda   : > { %2028 = vmatprep.subr.bf16.mxu0 %v2350_v3  ;;  %v2377_v54 = vld [vmem:[#allocation8 + $0x30] sm:$0xff]   ;;  %v1866_v56 = vld [vmem:[%s3237_s15] ss:$0 sm:$0xff] }
  0xdd   : > { %2029 = vmatpush3.bf16.msra.mxu0 %v2350_v3 }
  0xde   : > { %2030 = vmatprep.subr.bf16.mxu0 %v2351_v5 }
  0xe1   : > { %2031 = vmatpush3.bf16.msra.mxu0 %v2351_v5 }
  0xe2   : > { %2032 = vmatprep.subr.bf16.mxu0 %v2352_v6 }
  0xe5   : > { %2033 = vmatpush3.bf16.msra.mxu0 %v2352_v6 }
  0xe6   : > { %2034 = vmatprep.subr.bf16.mxu0 %v2353_v7 }
  0xe9   : > { %2035 = vmatpush3.bf16.msra.mxu0 %v2353_v7 }
  0xea   : > { %2036 = vmatprep.subr.bf16.mxu0 %v2354_v8 }
  0xed   : > { %2037 = vmatpush3.bf16.msra.mxu0 %v2354_v8 }
  0xee   : > { %2086 = vmatprep.subr.bf16.mxu0 %v2371_v17 }
  0xf0   : > { %2039 = vmatmul.mubr.bf16.vlgmr.msra.gmra.mrb[0].mxu0 %v2356_v9 }
  0xf1   : > { %2042 = vmatprep.mubr.bf16.mxu0 %v2357_v10  ;;  %2087 = vmatpush3.bf16.msra.mxu0 %v2371_v17 }
  0xf2   : > { %2088 = vmatprep.subr.bf16.mxu0 %v2372_v18 }
  0xf5   : > { %2089 = vmatpush3.bf16.msra.mxu0 %v2372_v18 }
  0xf6   : > { %2090 = vmatprep.subr.bf16.mxu0 %v2373_v19 }
  0xf8   : > { %2043 = vmatmul.mubr.bf16.gmra.mrb[4].mxu0 %v2358_v11 }
  0xf9   : > { %2046 = vmatprep.mubr.bf16.mxu0 %v2359_v12  ;;  %2091 = vmatpush3.bf16.msra.mxu0 %v2373_v19 }
  0xfa   : > { %2092 = vmatprep.subr.bf16.mxu0 %v2374_v20 }
  0xfd   : > { %2093 = vmatpush3.bf16.msra.mxu0 %v2374_v20 }
  0xfe   : > { %2094 = vmatprep.subr.bf16.mxu0 %v2375_v21 }
 0x100   : > { %2047 = vmatmul.mubr.bf16.gmra.mrb[8].mxu0 %v2360_v13 }
 0x101   : > { %2050 = vmatprep.mubr.bf16.mxu0 %v2361_v14  ;;  %2095 = vmatpush3.bf16.msra.mxu0 %v2375_v21 }
 0x102   : > { %2096 = vmatprep.subr.bf16.mxu0 %v2376_v22 }
 0x105   : > { %2097 = vmatpush3.bf16.msra.mxu0 %v2376_v22 }
 0x106   : > { %2098 = vmatprep.subr.bf16.mxu0 %v2377_v54 }
 0x108   : > { %2051 = vmatmul.mubr.bf16.gmra.mrb[12].mxu0 %v2362_v15 }
 0x109   : > { %2099 = vmatpush3.bf16.msra.mxu0 %v2377_v54 }
 0x10a   : > { %2100 = vmatprep.subr.bf16.mxu0 %v2378_v55 }
 0x10d   : > { %2101 = vmatpush3.bf16.msra.mxu0 %v2378_v55 }
 0x1c3   : > { %v2040_v23 = vpop.f32.mrb[0].mxu0 }
 0x1c4   : > { %v666_v24 = vpop.f32.mrb[1].mxu0 }
 0x1c5   : > { %v2041_v25 = vpop.f32.mrb[2].mxu0 }
 0x1c6   : > { %v730_v26 = vpack.c.bf16 %v2041_v25, %v2040_v23  ;;  %v669_v27 = vpop.f32.mrb[3].mxu0 }
 0x1c7   : > { %v729_v28 = vpack.c.bf16 %v669_v27, %v666_v24 }
 0x1c9   : > { %2054 = vmatprep.subr.bf16.mxu1 %v729_v28 }
 0x1ca   : > { %2055 = vmatpush3.bf16.msra.mxu1 %v729_v28 }
 0x1cb   : > { %v2044_v29 = vpop.f32.mrb[4].mxu0  ;;  %2056 = vmatprep.subr.bf16.mxu1 %v730_v26 }
 0x1cc   : > { %v682_v30 = vpop.f32.mrb[5].mxu0 }
 0x1cd   : > { %v2045_v31 = vpop.f32.mrb[6].mxu0 }
 0x1ce   : > { %v732_v32 = vpack.c.bf16 %v2045_v31, %v2044_v29  ;;  %v685_v33 = vpop.f32.mrb[7].mxu0  ;;  %2057 = vmatpush3.bf16.msra.mxu1 %v730_v26 }
 0x1cf   : > { %v731_v34 = vpack.c.bf16 %v685_v33, %v682_v30 }
 0x1d1   : > { %2058 = vmatprep.subr.bf16.mxu1 %v731_v34 }
 0x1d2   : > { %2059 = vmatpush3.bf16.msra.mxu1 %v731_v34 }
 0x1d3   : > { %v2048_v35 = vpop.f32.mrb[8].mxu0  ;;  %2060 = vmatprep.subr.bf16.mxu1 %v732_v32 }
 0x1d4   : > { %v698_v36 = vpop.f32.mrb[9].mxu0 }
 0x1d5   : > { %v2049_v37 = vpop.f32.mrb[10].mxu0 }
 0x1d6   : > { %v734_v38 = vpack.c.bf16 %v2049_v37, %v2048_v35  ;;  %v701_v39 = vpop.f32.mrb[11].mxu0  ;;  %2061 = vmatpush3.bf16.msra.mxu1 %v732_v32 }
 0x1d7   : > { %v733_v40 = vpack.c.bf16 %v701_v39, %v698_v36 }
 0x1d9   : > { %2062 = vmatprep.subr.bf16.mxu1 %v733_v40 }
 0x1da   : > { %2063 = vmatpush3.bf16.msra.mxu1 %v733_v40 }
 0x1db   : > { %v2052_v41 = vpop.f32.mrb[12].mxu0  ;;  %2064 = vmatprep.subr.bf16.mxu1 %v734_v38 }
 0x1dc   : > { %v714_v42 = vpop.f32.mrb[13].mxu0 }
 0x1dd   : > { %v2053_v43 = vpop.f32.mrb[14].mxu0 }
 0x1de   : > { %v736_v44 = vpack.c.bf16 %v2053_v43, %v2052_v41  ;;  %v717_v45 = vpop.f32.mrb[15].mxu0  ;;  %2065 = vmatpush3.bf16.msra.mxu1 %v734_v38 }
 0x1df   : > { %v735_v46 = vpack.c.bf16 %v717_v45, %v714_v42 }
 0x1e1   : > { %2066 = vmatprep.subr.bf16.mxu1 %v735_v46 }
 0x1e2   : > { %2067 = vmatpush3.bf16.msra.mxu1 %v735_v46 }
 0x1e3   : > { %2068 = vmatprep.subr.bf16.mxu1 %v736_v44 }
 0x1e6   : > { %2069 = vmatpush3.bf16.msra.mxu1 %v736_v44 }
 0x1e9   : > { %2071 = vmatmul.mubr.bf16.vlgmr.msra.gmra.mrb[0].mxu1 %v3037_v47 }
 0x1ea   : > { %2074 = vmatprep.mubr.bf16.mxu1 %v3040_v48 }
 0x1f1   : > { %2075 = vmatmul.mubr.bf16.gmra.mrb[4].mxu1 %v3045_v49 }
 0x1f2   : > { %2078 = vmatprep.mubr.bf16.mxu1 %v3048_v50 }
 0x1f9   : > { %2079 = vmatmul.mubr.bf16.gmra.mrb[8].mxu1 %v3053_v51 }
 0x1fa   : > { %2082 = vmatprep.mubr.bf16.mxu1 %v3056_v52 }
 0x201   : > { %2083 = vmatmul.mubr.bf16.gmra.mrb[12].mxu1 %v3061_v53 }
 0x202   : > { %2134 = vmatprep.mubr.bf16.mxu1 %v3033_v16 }
 0x2bc   : > { %v2072_v57 = vpop.f32.mrb[0].mxu1 }
 0x2bd   : > { %v832_v58 = vadd.f32 %v2072_v57, %v1866_v56  ;;  %v823_v59 = vpop.f32.mrb[1].mxu1 }
 0x2be   : > { %v824_v60 = vadd.f32 %v1866_v56, %v823_v59  ;;  %v2073_v61 = vpop.f32.mrb[2].mxu1  ;;  %v2380_v59 = vld [vmem:[#allocation10 + $0x8] sm:$0xff]  }
 0x2bf   : > { %v835_v62 = vadd.f32 %v2073_v61, %v1866_v56  ;;  %v826_v63 = vpop.f32.mrb[3].mxu1  ;;  %v888_v1 = vmax.f32 %v832_v58, 0.0  ;;  %v2379_v58 = vld [vmem:[#allocation10] sm:$0xff]   ;;  %v2382_v61 = vld [vmem:[#allocation10 + $0x18] sm:$0xff]  }
 0x2c0   : > { %v827_v0 = vadd.f32 %v1866_v56, %v826_v63  ;;  %v886_v3 = vmax.f32 %v824_v60, 0.0  ;;  %2150 = vmatprep.subr.bf16.mxu0 %v2379_v58  ;;  %v2381_v60 = vld [vmem:[#allocation10 + $0x10] sm:$0xff]  }
 0x2c1   : > { %v889_v2 = vmax.f32 %v835_v62, 0.0  ;;  %v2384_v62 = vld [vmem:[#allocation10 + $0x28] sm:$0xff]  }
 0x2c2   : > { %v887_v4 = vmax.f32 %v827_v0, 0.0 }
 0x2c3   : > { %v903_v5 = vpack.c.bf16 %v889_v2, %v888_v1 }
 0x2c4   : > { %v902_v6 = vpack.c.bf16 %v887_v4, %v886_v3  ;;  %v2076_v7 = vpop.f32.mrb[4].mxu1 }
 0x2c5   : > { %v848_v8 = vadd.f32 %v2076_v7, %v1866_v56  ;;  %v839_v9 = vpop.f32.mrb[5].mxu1 }
 0x2c6   : > { %v840_v10 = vadd.f32 %v1866_v56, %v839_v9  ;;  %v2077_v11 = vpop.f32.mrb[6].mxu1  ;;  %2102 = vmatprep.mubr.bf16.mxu0 %v902_v6 }
 0x2c7   : > { %v851_v12 = vadd.f32 %v2077_v11, %v1866_v56  ;;  %v842_v13 = vpop.f32.mrb[7].mxu1  ;;  %2103 = vmatmul.mubr.bf16.vlgmr.msra.gmra.mrb[16].mxu0 %v903_v5  ;;  %v892_v15 = vmax.f32 %v848_v8, 0.0 }
 0x2c8   : > { %v843_v14 = vadd.f32 %v1866_v56, %v842_v13  ;;  %v890_v18 = vmax.f32 %v840_v10, 0.0  ;;  %2151 = vmatpush3.bf16.msra.mxu0 %v2379_v58 }
 0x2c9   : > { %v893_v17 = vmax.f32 %v851_v12, 0.0  ;;  %2152 = vmatprep.subr.bf16.mxu0 %v2380_v59 }
 0x2ca   : > { %v891_v19 = vmax.f32 %v843_v14, 0.0 }
 0x2cb   : > { %v905_v20 = vpack.c.bf16 %v893_v17, %v892_v15 }
 0x2cc   : > { %v904_v21 = vpack.c.bf16 %v891_v19, %v890_v18  ;;  %v2080_v22 = vpop.f32.mrb[8].mxu1  ;;  %2153 = vmatpush3.bf16.msra.mxu0 %v2380_v59 }
 0x2cd   : > { %v864_v23 = vadd.f32 %v2080_v22, %v1866_v56  ;;  %v855_v24 = vpop.f32.mrb[9].mxu1  ;;  %2154 = vmatprep.subr.bf16.mxu0 %v2381_v60 }
 0x2ce   : > { %v856_v25 = vadd.f32 %v1866_v56, %v855_v24  ;;  %v2081_v26 = vpop.f32.mrb[10].mxu1  ;;  %2106 = vmatprep.mubr.bf16.mxu0 %v904_v21  ;;  %v2385_v24 = vld [vmem:[#allocation10 + $0x30] sm:$0xff]  }
 0x2cf   : > { %v867_v27 = vadd.f32 %v2081_v26, %v1866_v56  ;;  %v858_v28 = vpop.f32.mrb[11].mxu1  ;;  %2107 = vmatmul.mubr.bf16.gmra.mrb[20].mxu0 %v905_v20  ;;  %v896_v30 = vmax.f32 %v864_v23, 0.0  ;;  %v1883_v26 = vld [vmem:[%s3237_s15 + $0x1] ss:$0 sm:$0xff] }
 0x2d0   : > { %v859_v29 = vadd.f32 %v1866_v56, %v858_v28  ;;  %v894_v32 = vmax.f32 %v856_v25, 0.0  ;;  %2155 = vmatpush3.bf16.msra.mxu0 %v2381_v60  ;;  %v2386_v25 = vld [vmem:[#allocation10 + $0x38] sm:$0xff]  }
 0x2d1   : > { %v897_v31 = vmax.f32 %v867_v27, 0.0  ;;  %2156 = vmatprep.subr.bf16.mxu0 %v2382_v61 }
 0x2d2   : > { %v895_v33 = vmax.f32 %v859_v29, 0.0 }
 0x2d3   : > { %v907_v34 = vpack.c.bf16 %v897_v31, %v896_v30 }
 0x2d4   : > { %v906_v35 = vpack.c.bf16 %v895_v33, %v894_v32  ;;  %v2084_v36 = vpop.f32.mrb[12].mxu1  ;;  %2157 = vmatpush3.bf16.msra.mxu0 %v2382_v61 }
 0x2d5   : > { %v880_v37 = vadd.f32 %v2084_v36, %v1866_v56  ;;  %v871_v38 = vpop.f32.mrb[13].mxu1 }
 0x2d6   : > { %v872_v39 = vadd.f32 %v1866_v56, %v871_v38  ;;  %v2085_v40 = vpop.f32.mrb[14].mxu1  ;;  %2110 = vmatprep.mubr.bf16.mxu0 %v906_v35 }
 0x2d7   : > { %v883_v41 = vadd.f32 %v2085_v40, %v1866_v56  ;;  %v874_v42 = vpop.f32.mrb[15].mxu1  ;;  %2111 = vmatmul.mubr.bf16.gmra.mrb[24].mxu0 %v907_v34  ;;  %v900_v44 = vmax.f32 %v880_v37, 0.0 }
 0x2d8   : > { %v875_v43 = vadd.f32 %v1866_v56, %v874_v42  ;;  %v898_v46 = vmax.f32 %v872_v39, 0.0  ;;  %v2383_v56 = vld [vmem:[#allocation10 + $0x20] sm:$0xff]  }
 0x2d9   : > { %v901_v45 = vmax.f32 %v883_v41, 0.0  ;;  %2158 = vmatprep.subr.bf16.mxu0 %v2383_v56 }
 0x2da   : > { %v899_v54 = vmax.f32 %v875_v43, 0.0  ;;  %2159 = vmatpush3.bf16.msra.mxu0 %v2383_v56 }
 0x2db   : > { %v909_v55 = vpack.c.bf16 %v901_v45, %v900_v44  ;;  %2160 = vmatprep.subr.bf16.mxu0 %v2384_v62 }
 0x2dc   : > { %v908_v57 = vpack.c.bf16 %v899_v54, %v898_v46 }
 0x2de   : > { %2114 = vmatprep.mubr.bf16.mxu0 %v908_v57  ;;  %2161 = vmatpush3.bf16.msra.mxu0 %v2384_v62 }
 0x2df   : > { %2115 = vmatmul.mubr.bf16.gmra.mrb[28].mxu0 %v909_v55  ;;  %2162 = vmatprep.subr.bf16.mxu0 %v2385_v24 }
 0x2e2   : > { %2163 = vmatpush3.bf16.msra.mxu0 %v2385_v24 }
 0x2e3   : > { %2164 = vmatprep.subr.bf16.mxu0 %v2386_v25 }
 0x2e6   : > { %2165 = vmatpush3.bf16.msra.mxu0 %v2386_v25 }
 0x39a   : > { %v2104_v63 = vpop.f32.mrb[16].mxu0 }
 0x39b   : > { %v1009_v0 = vpop.f32.mrb[17].mxu0 }
 0x39c   : > { %v2105_v1 = vpop.f32.mrb[18].mxu0 }
 0x39d   : > { %v1073_v2 = vpack.c.bf16 %v2105_v1, %v2104_v63  ;;  %v1012_v3 = vpop.f32.mrb[19].mxu0 }
 0x39e   : > { %v1072_v4 = vpack.c.bf16 %v1012_v3, %v1009_v0 }
 0x3a0   : > { %2118 = vmatprep.subr.bf16.mxu1 %v1072_v4 }
 0x3a1   : > { %2119 = vmatpush3.bf16.msra.mxu1 %v1072_v4 }
 0x3a2   : > { %v2108_v5 = vpop.f32.mrb[20].mxu0  ;;  %2120 = vmatprep.subr.bf16.mxu1 %v1073_v2 }
 0x3a3   : > { %v1025_v6 = vpop.f32.mrb[21].mxu0 }
 0x3a4   : > { %v2109_v7 = vpop.f32.mrb[22].mxu0 }
 0x3a5   : > { %v1075_v8 = vpack.c.bf16 %v2109_v7, %v2108_v5  ;;  %v1028_v9 = vpop.f32.mrb[23].mxu0  ;;  %2121 = vmatpush3.bf16.msra.mxu1 %v1073_v2 }
 0x3a6   : > { %v1074_v10 = vpack.c.bf16 %v1028_v9, %v1025_v6 }
 0x3a8   : > { %2122 = vmatprep.subr.bf16.mxu1 %v1074_v10 }
 0x3a9   : > { %2123 = vmatpush3.bf16.msra.mxu1 %v1074_v10 }
 0x3aa   : > { %v2112_v11 = vpop.f32.mrb[24].mxu0  ;;  %2124 = vmatprep.subr.bf16.mxu1 %v1075_v8 }
 0x3ab   : > { %v1041_v12 = vpop.f32.mrb[25].mxu0 }
 0x3ac   : > { %v2113_v13 = vpop.f32.mrb[26].mxu0 }
 0x3ad   : > { %v1077_v14 = vpack.c.bf16 %v2113_v13, %v2112_v11  ;;  %v1044_v15 = vpop.f32.mrb[27].mxu0  ;;  %2125 = vmatpush3.bf16.msra.mxu1 %v1075_v8 }
 0x3ae   : > { %v1076_v17 = vpack.c.bf16 %v1044_v15, %v1041_v12 }
 0x3b0   : > { %2126 = vmatprep.subr.bf16.mxu1 %v1076_v17 }
 0x3b1   : > { %2127 = vmatpush3.bf16.msra.mxu1 %v1076_v17 }
 0x3b2   : > { %v2116_v18 = vpop.f32.mrb[28].mxu0  ;;  %2128 = vmatprep.subr.bf16.mxu1 %v1077_v14 }
 0x3b3   : > { %v1057_v19 = vpop.f32.mrb[29].mxu0 }
 0x3b4   : > { %v2117_v20 = vpop.f32.mrb[30].mxu0 }
 0x3b5   : > { %v1079_v21 = vpack.c.bf16 %v2117_v20, %v2116_v18  ;;  %v1060_v22 = vpop.f32.mrb[31].mxu0  ;;  %2129 = vmatpush3.bf16.msra.mxu1 %v1077_v14 }
 0x3b6   : > { %v1078_v23 = vpack.c.bf16 %v1060_v22, %v1057_v19 }
 0x3b8   : > { %2130 = vmatprep.subr.bf16.mxu1 %v1078_v23 }
 0x3b9   : > { %2131 = vmatpush3.bf16.msra.mxu1 %v1078_v23 }
 0x3ba   : > { %2132 = vmatprep.subr.bf16.mxu1 %v1079_v21 }
 0x3bd   : > { %2133 = vmatpush3.bf16.msra.mxu1 %v1079_v21 }
 0x3c0   : > { %2135 = vmatmul.mubr.bf16.vlgmr.msra.gmra.mrb[16].mxu1 %v3037_v47 }
 0x3c1   : > { %2138 = vmatprep.mubr.bf16.mxu1 %v3040_v48 }
 0x3c8   : > { %2139 = vmatmul.mubr.bf16.gmra.mrb[20].mxu1 %v3045_v49 }
 0x3c9   : > { %2142 = vmatprep.mubr.bf16.mxu1 %v3048_v50 }
 0x3d0   : > { %2143 = vmatmul.mubr.bf16.gmra.mrb[24].mxu1 %v3053_v51 }
 0x3d1   : > { %2146 = vmatprep.mubr.bf16.mxu1 %v3056_v52 }
 0x3d8   : > { %2147 = vmatmul.mubr.bf16.gmra.mrb[28].mxu1 %v3061_v53 }
 0x3d9   : > { %2198 = vmatprep.mubr.bf16.mxu1 %v3033_v16 }
 0x493   : > { %v2136_v27 = vpop.f32.mrb[16].mxu1 }
 0x494   : > { %v1127_v28 = vadd.f32 %v2136_v27, %v1883_v26  ;;  %v1118_v29 = vpop.f32.mrb[17].mxu1 }
 0x495   : > { %v1119_v30 = vadd.f32 %v1883_v26, %v1118_v29  ;;  %v2137_v31 = vpop.f32.mrb[18].mxu1 }
 0x496   : > { %v1130_v32 = vadd.f32 %v2137_v31, %v1883_v26  ;;  %v1121_v33 = vpop.f32.mrb[19].mxu1  ;;  %v1183_v35 = vmax.f32 %v1127_v28, 0.0 }
 0x497   : > { %v1122_v34 = vadd.f32 %v1883_v26, %v1121_v33  ;;  %v1181_v36 = vmax.f32 %v1119_v30, 0.0 }
 0x498   : > { %v1184_v16 = vmax.f32 %v1130_v32, 0.0 }
 0x499   : > { %v1182_v37 = vmax.f32 %v1122_v34, 0.0 }
 0x49a   : > { %v1198_v38 = vpack.c.bf16 %v1184_v16, %v1183_v35 }
 0x49b   : > { %v1197_v39 = vpack.c.bf16 %v1182_v37, %v1181_v36  ;;  %v2140_v40 = vpop.f32.mrb[20].mxu1 }
 0x49c   : > { %v1143_v41 = vadd.f32 %v2140_v40, %v1883_v26  ;;  %v1134_v42 = vpop.f32.mrb[21].mxu1 }
 0x49d   : > { %v1135_v43 = vadd.f32 %v1883_v26, %v1134_v42  ;;  %v2141_v44 = vpop.f32.mrb[22].mxu1  ;;  %2166 = vmatprep.mubr.bf16.mxu0 %v1197_v39 }
 0x49e   : > { %v1146_v45 = vadd.f32 %v2141_v44, %v1883_v26  ;;  %v1137_v46 = vpop.f32.mrb[23].mxu1  ;;  %2167 = vmatmul.mubr.bf16.vlgmr.msra.gmra.mrb[32].mxu0 %v1198_v38  ;;  %v1187_v55 = vmax.f32 %v1143_v41, 0.0 }
 0x49f   : > { %v1138_v54 = vadd.f32 %v1883_v26, %v1137_v46  ;;  %v1185_v58 = vmax.f32 %v1135_v43, 0.0 }
 0x4a0   : > { %v1188_v57 = vmax.f32 %v1146_v45, 0.0 }
 0x4a1   : > { %v1186_v59 = vmax.f32 %v1138_v54, 0.0 }
 0x4a2   : > { %v1200_v60 = vpack.c.bf16 %v1188_v57, %v1187_v55  ;;  %v2657_v57 = vmov 0.0  }
 0x4a3   : > { %v1199_v61 = vpack.c.bf16 %v1186_v59, %v1185_v58  ;;  %v2144_v56 = vpop.f32.mrb[24].mxu1  ;;  %2214 = vmatprep.subr.bf16.mxu0 %v2657_v57  ;;  %v2392_v58 = vld [vmem:[#allocation11 + $0x28] sm:$0xff]   ;;  %v2393_v59 = vld [vmem:[#allocation11 + $0x30] sm:$0xff]  }
 0x4a4   : > { %v1159_v62 = vadd.f32 %v2144_v56, %v1883_v26  ;;  %v1150_v63 = vpop.f32.mrb[25].mxu1 }
 0x4a5   : > { %v1151_v0 = vadd.f32 %v1883_v26, %v1150_v63  ;;  %v2145_v1 = vpop.f32.mrb[26].mxu1  ;;  %2170 = vmatprep.mubr.bf16.mxu0 %v1199_v61 }
 0x4a6   : > { %v1162_v2 = vadd.f32 %v2145_v1, %v1883_v26  ;;  %v1153_v3 = vpop.f32.mrb[27].mxu1  ;;  %2171 = vmatmul.mubr.bf16.gmra.mrb[36].mxu0 %v1200_v60  ;;  %v1191_v5 = vmax.f32 %v1159_v62, 0.0  ;;  %v1892_v60 = vld [vmem:[%s3237_s15 + $0x2] ss:$0 sm:$0xff] }
 0x4a7   : > { %v1154_v4 = vadd.f32 %v1883_v26, %v1153_v3  ;;  %v1189_v7 = vmax.f32 %v1151_v0, 0.0 }
 0x4a8   : > { %v1192_v6 = vmax.f32 %v1162_v2, 0.0 }
 0x4a9   : > { %v1190_v8 = vmax.f32 %v1154_v4, 0.0 }
 0x4aa   : > { %v1202_v9 = vpack.c.bf16 %v1192_v6, %v1191_v5 }
 0x4ab   : > { %v1201_v10 = vpack.c.bf16 %v1190_v8, %v1189_v7  ;;  %v2148_v11 = vpop.f32.mrb[28].mxu1 }
 0x4ac   : > { %v1175_v12 = vadd.f32 %v2148_v11, %v1883_v26  ;;  %v1166_v13 = vpop.f32.mrb[29].mxu1 }
 0x4ad   : > { %v1167_v14 = vadd.f32 %v1883_v26, %v1166_v13  ;;  %v2149_v15 = vpop.f32.mrb[30].mxu1  ;;  %2174 = vmatprep.mubr.bf16.mxu0 %v1201_v10 }
 0x4ae   : > { %v1178_v17 = vadd.f32 %v2149_v15, %v1883_v26  ;;  %v1169_v18 = vpop.f32.mrb[31].mxu1  ;;  %2175 = vmatmul.mubr.bf16.gmra.mrb[40].mxu0 %v1202_v9  ;;  %v1195_v20 = vmax.f32 %v1175_v12, 0.0 }
 0x4af   : > { %v1170_v19 = vadd.f32 %v1883_v26, %v1169_v18  ;;  %v1193_v22 = vmax.f32 %v1167_v14, 0.0 }
 0x4b0   : > { %v1196_v21 = vmax.f32 %v1178_v17, 0.0 }
 0x4b1   : > { %v1194_v23 = vmax.f32 %v1170_v19, 0.0 }
 0x4b2   : > { %v1204_v24 = vpack.c.bf16 %v1196_v21, %v1195_v20 }
 0x4b3   : > { %v1203_v25 = vpack.c.bf16 %v1194_v23, %v1193_v22 }
 0x4b5   : > { %2178 = vmatprep.mubr.bf16.mxu0 %v1203_v25 }
 0x4b6   : > { %2179 = vmatmul.mubr.bf16.gmra.mrb[44].mxu0 %v1204_v24 }
 0x4b7   : > { %2230 = vmatprep.mubr.msk.bf16.mxu0 %vm2658_vm0, %v2657_v57 }
 0x571   : > { %v2168_v27 = vpop.f32.mrb[32].mxu0 }
 0x572   : > { %v1304_v28 = vpop.f32.mrb[33].mxu0 }
 0x573   : > { %v2169_v29 = vpop.f32.mrb[34].mxu0 }
 0x574   : > { %v1368_v30 = vpack.c.bf16 %v2169_v29, %v2168_v27  ;;  %v1307_v31 = vpop.f32.mrb[35].mxu0 }
 0x575   : > { %v1367_v32 = vpack.c.bf16 %v1307_v31, %v1304_v28 }
 0x577   : > { %2182 = vmatprep.subr.bf16.mxu1 %v1367_v32 }
 0x578   : > { %2183 = vmatpush3.bf16.msra.mxu1 %v1367_v32 }
 0x579   : > { %v2172_v33 = vpop.f32.mrb[36].mxu0  ;;  %2184 = vmatprep.subr.bf16.mxu1 %v1368_v30 }
 0x57a   : > { %v1320_v34 = vpop.f32.mrb[37].mxu0 }
 0x57b   : > { %v2173_v26 = vpop.f32.mrb[38].mxu0 }
 0x57c   : > { %v1370_v35 = vpack.c.bf16 %v2173_v26, %v2172_v33  ;;  %v1323_v16 = vpop.f32.mrb[39].mxu0  ;;  %2185 = vmatpush3.bf16.msra.mxu1 %v1368_v30 }
 0x57d   : > { %v1369_v36 = vpack.c.bf16 %v1323_v16, %v1320_v34 }
 0x57f   : > { %2186 = vmatprep.subr.bf16.mxu1 %v1369_v36 }
 0x580   : > { %2187 = vmatpush3.bf16.msra.mxu1 %v1369_v36 }
 0x581   : > { %v2176_v37 = vpop.f32.mrb[40].mxu0  ;;  %2188 = vmatprep.subr.bf16.mxu1 %v1370_v35 }
 0x582   : > { %v1336_v38 = vpop.f32.mrb[41].mxu0 }
 0x583   : > { %v2177_v39 = vpop.f32.mrb[42].mxu0 }
 0x584   : > { %v1372_v40 = vpack.c.bf16 %v2177_v39, %v2176_v37  ;;  %v1339_v41 = vpop.f32.mrb[43].mxu0  ;;  %2189 = vmatpush3.bf16.msra.mxu1 %v1370_v35 }
 0x585   : > { %v1371_v42 = vpack.c.bf16 %v1339_v41, %v1336_v38 }
 0x587   : > { %2190 = vmatprep.subr.bf16.mxu1 %v1371_v42 }
 0x588   : > { %2191 = vmatpush3.bf16.msra.mxu1 %v1371_v42 }
 0x589   : > { %v2180_v43 = vpop.f32.mrb[44].mxu0  ;;  %2192 = vmatprep.subr.bf16.mxu1 %v1372_v40 }
 0x58a   : > { %v1352_v44 = vpop.f32.mrb[45].mxu0 }
 0x58b   : > { %v2181_v45 = vpop.f32.mrb[46].mxu0 }
 0x58c   : > { %v1374_v46 = vpack.c.bf16 %v2181_v45, %v2180_v43  ;;  %v1355_v54 = vpop.f32.mrb[47].mxu0  ;;  %2193 = vmatpush3.bf16.msra.mxu1 %v1372_v40 }
 0x58d   : > { %v1373_v55 = vpack.c.bf16 %v1355_v54, %v1352_v44 }
 0x58f   : > { %2194 = vmatprep.subr.bf16.mxu1 %v1373_v55 }
 0x590   : > { %2195 = vmatpush3.bf16.msra.mxu1 %v1373_v55 }
 0x591   : > { %2196 = vmatprep.subr.bf16.mxu1 %v1374_v46 }
 0x594   : > { %2197 = vmatpush3.bf16.msra.mxu1 %v1374_v46 }
 0x595   : > { %2234 = vmatprep.subr.bf16.mxu1 %v2657_v57 }
 0x597   : > { %2199 = vmatmul.mubr.bf16.vlgmr.msra.gmra.mrb[32].mxu1 %v3037_v47  ;;  %v2387_v47 = vld [vmem:[#allocation11] sm:$0xff]  }
 0x598   : > { %2202 = vmatprep.mubr.bf16.mxu1 %v3040_v48  ;;  %v2659_v48 = vmov 0   ;;  %2235 = vmatpush3.bf16.msra.mxu1 %v2387_v47 }
 0x599   : > { %2346 = vset.pattern.permute.xlu0 %v2659_v48  ;;  %2236 = vmatprep.subr.bf16.mxu1 %v2657_v57 }
 0x59f   : > { %2203 = vmatmul.mubr.bf16.gmra.mrb[36].mxu1 %v3045_v49  ;;  %v2388_v49 = vld [vmem:[#allocation11 + $0x8] sm:$0xff]  }
 0x5a0   : > { %2206 = vmatprep.mubr.bf16.mxu1 %v3048_v50  ;;  %v1541_v50 = vld [vmem:[%s485_s24] sm:$0xff]  ;;  %2237 = vmatpush3.bf16.msra.mxu1 %v2388_v49 }
 0x5a1   : > { %1544 = vperm.xlu0 %2346, %v1541_v50   ;;  %2238 = vmatprep.subr.bf16.mxu1 %v2657_v57  ;;  %v1500_v50 = vld [vmem:[%s2990_s1] sm:$0xf]  ;;  %s481_s1 = scalar_lea.vmem [#allocation13], %s1848_s21 }
 0x5a2   : > { %s1673_s19 = sshll.u32 %s481_s1, 4  ;;  %s3123_s19 = int_to_ptr.vmem [resolvable:$true] %s1673_s19 }
 0x5a3   : > { %s2569_s13 = scalar_lea.vmem %s3123_s19, 128  ;;  %p2576_p10 = scmp.lt.s32.totalorder %s3123_s19, %s2574_s29 }
 0x5a4   : > { %p2570_p12 = scmp.ne.s32.totalorder %s3123_s19, %s2569_s13  ;;  %p2577_p4 = scmp.lt.s32.totalorder %s2575_s16, %s2569_s13 }
 0x5a6   : > { %p2571_p6 = pnand %p2570_p12, %p3241_p2  ;;  %p2578_p5 = por %p2577_p4, %p2576_p10 }
 0x5a7   : > { %2207 = vmatmul.mubr.bf16.gmra.mrb[40].mxu1 %v3053_v51  ;;  %v2389_v51 = vld [vmem:[#allocation11 + $0x10] sm:$0xff]  }
 0x5a8   : > { %2210 = vmatprep.mubr.bf16.mxu1 %v3056_v52  ;;  %2239 = vmatpush3.bf16.msra.mxu1 %v2389_v51  ;;  %v2390_v52 = vld [vmem:[#allocation11 + $0x18] sm:$0xff]   ;;  %p2572_p9 = pneg %p2571_p6 }
 0x5a9   : > { %2240 = vmatprep.subr.bf16.mxu1 %v2657_v57  ;;  %v2394_v51 = vld [vmem:[#allocation11 + $0x38] sm:$0xff]  }
 0x5aa   : > { %p2579_p1 = pnand %p2578_p5, %p2572_p9 }
 0x5ac   : > { %2241 = vmatpush3.bf16.msra.mxu1 %v2390_v52 }
 0x5ad   : > { %2242 = vmatprep.subr.bf16.mxu1 %v2657_v57 }
 0x5af   : > { %2211 = vmatmul.mubr.bf16.gmra.mrb[44].mxu1 %v3061_v53  ;;  %v2391_v53 = vld [vmem:[#allocation11 + $0x20] sm:$0xff]  }
 0x5b0   : > { %2250 = vmatprep.mubr.msk.bf16.mxu1 %vm2658_vm0, %v2657_v57  ;;  %2243 = vmatpush3.bf16.msra.mxu1 %v2391_v53 }
 0x5b1   : > { %2244 = vmatprep.subr.bf16.mxu1 %v2657_v57 }
 0x5b4   : > { %2245 = vmatpush3.bf16.msra.mxu1 %v2392_v58 }
 0x5b5   : > { %2246 = vmatprep.subr.bf16.mxu1 %v2657_v57 }
 0x5b8   : > { %2247 = vmatpush3.bf16.msra.mxu1 %v2393_v59 }
 0x5b9   : > { %2248 = vmatprep.subr.bf16.mxu1 %v2657_v57 }
 0x5bc   : > { %2249 = vmatpush3.bf16.msra.mxu1 %v2394_v51 }
 0x620   : > { %v1545_v52 = vpop.permute.xlu0 %1544 }
 0x66a   : > { %v2200_v61 = vpop.f32.mrb[32].mxu1 }
 0x66b   : > { %v1422_v56 = vadd.f32 %v2200_v61, %v1892_v60  ;;  %v1413_v62 = vpop.f32.mrb[33].mxu1 }
 0x66c   : > { %v1414_v63 = vadd.f32 %v1892_v60, %v1413_v62  ;;  %v2201_v0 = vpop.f32.mrb[34].mxu1 }
 0x66d   : > { %v1425_v1 = vadd.f32 %v2201_v0, %v1892_v60  ;;  %v1416_v2 = vpop.f32.mrb[35].mxu1  ;;  %v1478_v4 = vmax.f32 %v1422_v56, 0.0 }
 0x66e   : > { %v1417_v3 = vadd.f32 %v1892_v60, %v1416_v2  ;;  %v1476_v6 = vmax.f32 %v1414_v63, 0.0 }
 0x66f   : > { %v1479_v5 = vmax.f32 %v1425_v1, 0.0 }
 0x670   : > { %v1477_v7 = vmax.f32 %v1417_v3, 0.0 }
 0x671   : > { %v1493_v8 = vpack.c.bf16 %v1479_v5, %v1478_v4 }
 0x672   : > { %v1492_v9 = vpack.c.bf16 %v1477_v7, %v1476_v6  ;;  %v2204_v10 = vpop.f32.mrb[36].mxu1 }
 0x673   : > { %v1438_v11 = vadd.f32 %v2204_v10, %v1892_v60  ;;  %v1429_v12 = vpop.f32.mrb[37].mxu1 }
 0x674   : > { %v1430_v13 = vadd.f32 %v1892_v60, %v1429_v12  ;;  %v2205_v14 = vpop.f32.mrb[38].mxu1  ;;  %2215 = vmatpush3.bf16.msra.mxu0 %v1492_v9 }
 0x675   : > { %v1441_v15 = vadd.f32 %v2205_v14, %v1892_v60  ;;  %v1432_v17 = vpop.f32.mrb[39].mxu1  ;;  %2216 = vmatprep.subr.bf16.mxu0 %v2657_v57  ;;  %v1482_v19 = vmax.f32 %v1438_v11, 0.0 }
 0x676   : > { %v1433_v18 = vadd.f32 %v1892_v60, %v1432_v17  ;;  %v1480_v21 = vmax.f32 %v1430_v13, 0.0 }
 0x677   : > { %v1483_v20 = vmax.f32 %v1441_v15, 0.0 }
 0x678   : > { %v1481_v22 = vmax.f32 %v1433_v18, 0.0  ;;  %2217 = vmatpush3.bf16.msra.mxu0 %v1493_v8 }
 0x679   : > { %v1495_v23 = vpack.c.bf16 %v1483_v20, %v1482_v19  ;;  %2218 = vmatprep.subr.bf16.mxu0 %v2657_v57 }
 0x67a   : > { %v1494_v24 = vpack.c.bf16 %v1481_v22, %v1480_v21  ;;  %v2208_v25 = vpop.f32.mrb[40].mxu1 }
 0x67b   : > { %v1454_v27 = vadd.f32 %v2208_v25, %v1892_v60  ;;  %v1445_v28 = vpop.f32.mrb[41].mxu1 }
 0x67c   : > { %v1446_v29 = vadd.f32 %v1892_v60, %v1445_v28  ;;  %v2209_v30 = vpop.f32.mrb[42].mxu1  ;;  %2219 = vmatpush3.bf16.msra.mxu0 %v1494_v24 }
 0x67d   : > { %v1457_v31 = vadd.f32 %v2209_v30, %v1892_v60  ;;  %v1448_v32 = vpop.f32.mrb[43].mxu1  ;;  %2220 = vmatprep.subr.bf16.mxu0 %v2657_v57  ;;  %v1486_v34 = vmax.f32 %v1454_v27, 0.0 }
 0x67e   : > { %v1449_v33 = vadd.f32 %v1892_v60, %v1448_v32  ;;  %v1484_v35 = vmax.f32 %v1446_v29, 0.0 }
 0x67f   : > { %v1487_v26 = vmax.f32 %v1457_v31, 0.0 }
 0x680   : > { %v1485_v16 = vmax.f32 %v1449_v33, 0.0  ;;  %2221 = vmatpush3.bf16.msra.mxu0 %v1495_v23 }
 0x681   : > { %v1497_v36 = vpack.c.bf16 %v1487_v26, %v1486_v34  ;;  %2222 = vmatprep.subr.bf16.mxu0 %v2657_v57 }
 0x682   : > { %v1496_v37 = vpack.c.bf16 %v1485_v16, %v1484_v35  ;;  %v2212_v38 = vpop.f32.mrb[44].mxu1 }
 0x683   : > { %v1470_v39 = vadd.f32 %v2212_v38, %v1892_v60  ;;  %v1461_v40 = vpop.f32.mrb[45].mxu1 }
 0x684   : > { %v1462_v41 = vadd.f32 %v1892_v60, %v1461_v40  ;;  %v2213_v42 = vpop.f32.mrb[46].mxu1  ;;  %2223 = vmatpush3.bf16.msra.mxu0 %v1496_v37 }
 0x685   : > { %v1473_v43 = vadd.f32 %v2213_v42, %v1892_v60  ;;  %v1464_v44 = vpop.f32.mrb[47].mxu1  ;;  %2224 = vmatprep.subr.bf16.mxu0 %v2657_v57  ;;  %v1490_v46 = vmax.f32 %v1470_v39, 0.0 }
 0x686   : > { %v1465_v45 = vadd.f32 %v1892_v60, %v1464_v44  ;;  %v1488_v55 = vmax.f32 %v1462_v41, 0.0 }
 0x687   : > { %v1491_v54 = vmax.f32 %v1473_v43, 0.0 }
 0x688   : > { %v1489_v47 = vmax.f32 %v1465_v45, 0.0  ;;  %2225 = vmatpush3.bf16.msra.mxu0 %v1497_v36 }
 0x689   : > { %v1499_v48 = vpack.c.bf16 %v1491_v54, %v1490_v46  ;;  %2226 = vmatprep.subr.bf16.mxu0 %v2657_v57 }
 0x68a   : > { %v1498_v49 = vpack.c.bf16 %v1489_v47, %v1488_v55 }
 0x68c   : > { %2227 = vmatpush3.bf16.msra.mxu0 %v1498_v49 }
 0x68d   : > { %2228 = vmatprep.subr.bf16.mxu0 %v2657_v57  ;;  %v1893_v57 = vld [vmem:[%s3237_s15 + $0x3] ss:$0 sm:$0xff] }
 0x690   : > { %2229 = vmatpush3.bf16.msra.mxu0 %v1499_v48 }
 0x693   : > { %2231 = vmatmul.mubr.bf16.vlgmr.msra.gmra.mrb[48].mxu0 %v1500_v50 }
 0x766   : > { %v1535_v53 = vpop.f32.mrb[48].mxu0 }
 0x767   : > { %v1547_v58 = vmul.f32 %v1545_v52, %v1535_v53  ;;  %v2232_v59 = vpop.f32.mrb[49].mxu0 }
 0x768   : > { %v1538_v60 = vpop.f32.mrb[50].mxu0 }
 0x769   : > { %v1548_v61 = vpack.c.bf16 %v1547_v58, %v1547_v58  ;;  %v2233_v56 = vpop.f32.mrb[51].mxu0 }
 0x76b   : > { %2251 = vmatmul.mubr.bf16.vlgmr.msra.gmra.mrb[48].mxu1 %v1548_v61 }
 0x83e   : > { %v1652_v62 = vpop.f32.mrb[48].mxu1 }
 0x83f   : > { %v1653_v63 = vadd.f32 %v1893_v57, %v1652_v62  ;;  %v2252_v0 = vpop.f32.mrb[49].mxu1 }
 0x840   : > { %v1655_v1 = vpop.f32.mrb[50].mxu1 }
 0x841   : > { %1658 = vst [vmem:[%s481_s1] sm:$0xff] %v1653_v63  ;;  %v2253_v2 = vpop.f32.mrb[51].mxu1 }
 0x842   : > { %2582 = shalt.err (!%p2579_p1)
}
 0x843   : > { %s2583_s18 = scalar_lea.hbm %s3121_s23, 128  ;;  %s2587_s30 = scalar_lea.hbm %s3240_s17, 1152 }
 0x844   : > { %p2584_p7 = scmp.ne.s32.totalorder %s3121_s23, %s2583_s18  ;;  %p2588_p13 = scmp.lt.u32.totalorder %s3121_s23, %s3240_s17 }
 0x845   : > { %p2589_p3 = scmp.lt.u32.totalorder %s2587_s30, %s2583_s18  ;;  %p2591_p12 = scmp.lt.u32.totalorder %s2583_s18, %s3121_s23 }
 0x846   : > { %p2585_p0 = pnand %p2584_p7, %p3241_p2 }
 0x847   : > { %p2590_p8 = por %p2589_p3, %p2588_p13 }
 0x848   : > { %p2586_p11 = pneg %p2585_p0 }
 0x849   : > { %p2592_p6 = por %p2591_p12, %p2590_p8 }
 0x84b   : > { %p2593_p9 = pnand %p2592_p6, %p2586_p11 }
 0x84d   : > { %2596 = shalt.err (!%p2593_p9)
}
 0x84e   : > { %2272 = dma.vmem_to_hbm [thread:$0]  (%p3241_p2), %s3123_s19, 128, %s3121_s23, %s1660_s26  }
 0x84f PF: > { %s3242_s5 = sld [smem:[#allocation19_spill]]  ;;  %s3243_s21 = sld [smem:[#allocation24_spill]] }
 0x850   : > { %p2305_p10 = scmp.ge.s32.totalorder %s2647_s12, 2 }
 0x855   : > { %s1685_s11 = sand.u32 1, %s3242_s5   ;;  %p3244_p4 = scmp.ne.s32.totalorder %s3243_s21, 0 }
 0x856   : > { %s1686_s27 = scalar_lea.sflag [#allocation4], %s1685_s11 }
 0x857   : > { %p2295_p5 = pnand %p2305_p10, %p3244_p4 }
 0x859   : > { %2630 = dma.done.wait (!%p2295_p5), %s1686_s27, 128  }
 0x85a   : > { %2632 = vsyncadd (!%p2295_p5), %s1686_s27, 4294967168  ;;  %s3245_s12 = sld [smem:[#allocation21_spill]]  ;;  %s3246_s8 = sld [smem:[#allocation20_spill]] }
 0x85b   : > { %s3247_s11 = sld [smem:[#allocation22_spill]]  ;;  %s3248_s30 = smov %s2639_s10 }
 0x860   : > { %p27_p1 = scmp.ge.s32.totalorder %s3245_s12, 11   ;;  %s3249_s10 = smov %s3246_s8 }
 0x862   :  { %29 = sbr.rel (!%p27_p1) target bundleno = 15 (0xf), region = 140 }
 0x869   :  { %1691 = vsyncpa [#allocation3], 1 }
 0x86a   :  { %1693 = vsyncpa [#allocation3 + $0x1], 1 }
 0x86b   :  { %1694 = vsyncpa [#allocation6], 1 }
 0x86c   :  { %1696 = vsyncpa [#allocation6 + $0x1], 1 }
 0x86d   :  { %1697 = vsyncpa [#allocation9], 1 }
 0x86e   :  { %1698 = vsyncpa [#allocation12], 1 }
 0x86f   :  { %1699 = vsyncpa [#allocation4], 1 }
 0x870   :  { %1701 = vsyncpa [#allocation4 + $0x1], 1 }

</bundles_post_ra>
